<compile_context>
chip_gen: v5e
topology: v5e:2x2
jax: 0.10.0
libtpu: 0.0.40
codegen_flags: <defaults>
</compile_context>

<pallas_src>
import functools
import math

import jax
import jax.numpy as jnp
from jax.experimental import pallas as pl
from jax.experimental.pallas import tpu as pltpu

# ---------------- small BERT-like config ----------------
VOCAB = 64          # len(tokenizer) after resize (synthetic)
HIDDEN = 32         # bert.config.hidden_size
N_LAYERS = 2
N_HEADS = 2
HEAD_DIM = HIDDEN // N_HEADS
INTERMEDIATE = 64
MAX_POS = 16
PROJ_DIM = 16       # projection_dim (small-shape stand-in for 128)
SEQ = 8
BATCH = 2
LN_EPS_BERT = 1e-12   # HF BertLayerNorm eps
LN_EPS_PROJ = 1e-5    # torch.nn.LayerNorm default eps
OUT_LANES = 128       # lane-dense packed output width


# ---------------- math helpers (lower-safe, value-level) ----------------
def _erf(x):
    # Abramowitz & Stegun 7.1.26 rational approximation of erf (|err| < 1.5e-7),
    # built only from VPU/EUP ops guaranteed to lower in Mosaic.
    a1, a2, a3, a4, a5 = 0.254829592, -0.284496736, 1.421413741, -1.453152027, 1.061405429
    p_ = 0.3275911
    sign = jnp.where(x >= 0.0, 1.0, -1.0)
    ax = jnp.abs(x)
    # divide routed through the (otherwise idle) EUP reciprocal path
    t = pl.reciprocal(1.0 + p_ * ax, approx=False)
    poly = ((((a5 * t + a4) * t + a3) * t + a2) * t + a1) * t
    return sign * (1.0 - poly * jnp.exp(-ax * ax))


def _gelu_exact(x):
    # matches torch.nn.GELU() (approximate='none') up to ~1e-7
    return 0.5 * x * (1.0 + _erf(x * (1.0 / math.sqrt(2.0))))


def _layer_norm(x, gamma, beta, eps):
    mu = jnp.mean(x, axis=-1, keepdims=True)
    var = jnp.mean(jnp.square(x - mu), axis=-1, keepdims=True)   # biased, like torch
    return (x - mu) * jax.lax.rsqrt(var + eps) * gamma + beta


# ---------------- the fused Pallas kernel ----------------
def _fused_forward_kernel(
    ids_ref, mask_ref, wemb_ref, pt_ref, wqkv_ref, ow_ref, iw_ref, fw_ref,
    lvec_ref, headw_ref, mvec_ref, out_ref, *,
    batch, seq, n_heads, head_dim, n_layers, vocab, proj_dim):
    m = batch * seq
    hidden = n_heads * head_dim
    inter = iw_ref.shape[-1]
    scale = 1.0 / math.sqrt(head_dim)

    mv = mvec_ref[...]                                   # (8, 128) misc vector slab

    # ---- embeddings: gather as one-hot @ table (MXU), + pre-tiled pos/type, LN ----
    ids = ids_ref[...]                                   # (m, 1) int32
    iota = jax.lax.broadcasted_iota(jnp.int32, (m, vocab), 1)
    onehot = jnp.where(iota == ids, 1.0, 0.0)
    x = jnp.dot(onehot, wemb_ref[...], preferred_element_type=jnp.float32)
    x = x + pt_ref[...]                                  # (m, hidden), pre-tiled host-side
    x = _layer_norm(x, mv[0:1, :hidden], mv[1:2, :hidden], LN_EPS_BERT)

    mask = mask_ref[...]                                 # (batch, 1, seq) additive mask

    # ---- transformer encoder ----
    # TODO(synk): at real depth, replace the unrolled Python loop with a layer
    # grid axis / fori_loop over the stacked (L, ...) refs to bound live ranges.
    for l in range(n_layers):
        lv = lvec_ref[l]                                 # (8, 128) per-layer vector slab

        # fused QKV: one MXU push instead of three
        qkv = jnp.dot(x, wqkv_ref[l], preferred_element_type=jnp.float32) + lv[0:1, :3 * hidden]
        qkv3 = qkv.reshape(batch, seq, 3 * hidden)       # split rows into (B, S) - tile-aligned

        heads = []
        for h in range(n_heads):
            c0 = h * head_dim
            q = qkv3[:, :, c0:c0 + head_dim]                               # (B, S, D)
            k = qkv3[:, :, hidden + c0:hidden + c0 + head_dim]             # (B, S, D)
            v = qkv3[:, :, 2 * hidden + c0:2 * hidden + c0 + head_dim]     # (B, S, D)
            # batched score matmul; contraction on last dims -> no explicit K transpose
            s = jnp.einsum("bqd,bkd->bqk", q, k,
                           preferred_element_type=jnp.float32) * scale + mask
            s = s - jnp.max(s, axis=-1, keepdims=True)
            p = jnp.exp(s)                                                 # max term gives exp(0)=1
            p = p * pl.reciprocal(jnp.sum(p, axis=-1, keepdims=True), approx=True)  # EUP
            heads.append(jnp.einsum("bqk,bkd->bqd", p, v,
                                    preferred_element_type=jnp.float32))   # (B, S, D)
        ctx = jnp.concatenate(heads, axis=-1).reshape(m, hidden)           # one concat per layer

        attn_out = jnp.dot(ctx, ow_ref[l], preferred_element_type=jnp.float32) + lv[1:2, :hidden]
        x = _layer_norm(x + attn_out, lv[2:3, :hidden], lv[3:4, :hidden], LN_EPS_BERT)

        hmid = _gelu_exact(jnp.dot(x, iw_ref[l], preferred_element_type=jnp.float32)
                           + lv[4:5, :inter])
        ffn = jnp.dot(hmid, fw_ref[l], preferred_element_type=jnp.float32) + lv[5:6, :hidden]
        x = _layer_norm(x + ffn, lv[6:7, :hidden], lv[7:8, :hidden], LN_EPS_BERT)

    # ---- heads ----
    hw = headw_ref[...]                                  # (2*hidden, vocab) head-weight slab
    # mlm_logits = mlm_head(GELU(last_hidden_state))
    mlm = jnp.dot(_gelu_exact(x), hw[0:hidden, :vocab],
                  preferred_element_type=jnp.float32) + mv[2:3, :vocab]    # (m, vocab)
    # projection head + LN applied to ALL rows; wrapper picks the CLS rows.
    # (avoids the in-kernel per-batch CLS gather; negligible extra FLOPs here)
    proj = jnp.dot(x, hw[hidden:2 * hidden, :proj_dim],
                   preferred_element_type=jnp.float32) + mv[3:4, :proj_dim]
    proj = _layer_norm(proj, mv[4:5, :proj_dim], mv[5:6, :proj_dim], LN_EPS_PROJ)   # (m, proj_dim)

    # ---- pack both heads into one lane-dense (m, OUT_LANES) slab, single full vst ----
    pad = jnp.zeros((m, OUT_LANES - vocab - proj_dim), jnp.float32)
    out_ref[...] = jnp.concatenate([mlm, proj, pad], axis=-1)


# ---------------- parameters (deterministic, synthetic) ----------------
def init_params(key):
    def nrm(k, shape):
        return 0.02 * jax.random.normal(k, shape, jnp.float32)

    keys = iter(jax.random.split(key, 128))
    p = {
        "word_emb": nrm(next(keys), (VOCAB, HIDDEN)),
        "pos_emb": nrm(next(keys), (MAX_POS, HIDDEN)),
        "type_emb": nrm(next(keys), (2, HIDDEN)),
        "emb_ln_g": jnp.ones((HIDDEN,), jnp.float32),
        "emb_ln_b": jnp.zeros((HIDDEN,), jnp.float32),
        "layers": [],
    }
    for _ in range(N_LAYERS):
        lp = {
            "q_w": nrm(next(keys), (HIDDEN, HIDDEN)), "q_b": nrm(next(keys), (HIDDEN,)),
            "k_w": nrm(next(keys), (HIDDEN, HIDDEN)), "k_b": nrm(next(keys), (HIDDEN,)),
            "v_w": nrm(next(keys), (HIDDEN, HIDDEN)), "v_b": nrm(next(keys), (HIDDEN,)),
            "o_w": nrm(next(keys), (HIDDEN, HIDDEN)), "o_b": nrm(next(keys), (HIDDEN,)),
            "attn_ln_g": jnp.ones((HIDDEN,), jnp.float32),
            "attn_ln_b": jnp.zeros((HIDDEN,), jnp.float32),
            "i_w": nrm(next(keys), (HIDDEN, INTERMEDIATE)),
            "i_b": nrm(next(keys), (INTERMEDIATE,)),
            "f_w": nrm(next(keys), (INTERMEDIATE, HIDDEN)),
            "f_b": nrm(next(keys), (HIDDEN,)),
            "ffn_ln_g": jnp.ones((HIDDEN,), jnp.float32),
            "ffn_ln_b": jnp.zeros((HIDDEN,), jnp.float32),
        }
        p["layers"].append(lp)
    p["mlm_w"] = nrm(next(keys), (HIDDEN, VOCAB))
    p["mlm_b"] = nrm(next(keys), (VOCAB,))
    p["proj_w"] = nrm(next(keys), (HIDDEN, PROJ_DIM))
    p["proj_b"] = nrm(next(keys), (PROJ_DIM,))
    p["proj_ln_g"] = jnp.ones((PROJ_DIM,), jnp.float32)
    p["proj_ln_b"] = jnp.zeros((PROJ_DIM,), jnp.float32)
    return p


def pack_params(p, batch, seq):
    """Host-side packing: fused QKV, pre-tiled pos/type, and lane-dense slabs
    for the ~24 tiny bias / LayerNorm / projection vectors (3 slabs total)."""
    def row(v):
        v = v.reshape(1, -1)
        return jnp.pad(v, ((0, 0), (0, 128 - v.shape[1])))

    def stack(fn):
        return jnp.stack([fn(lp) for lp in p["layers"]], axis=0)

    # per-layer vector slab (L, 8, 128):
    # rows: 0=bqkv(96) 1=o_b 2=ln1_g 3=ln1_b 4=i_b(64) 5=f_b 6=ln2_g 7=ln2_b
    layer_vecs = stack(lambda lp: jnp.concatenate([
        row(jnp.concatenate([lp["q_b"], lp["k_b"], lp["v_b"]])),
        row(lp["o_b"]),
        row(lp["attn_ln_g"]), row(lp["attn_ln_b"]),
        row(lp["i_b"]), row(lp["f_b"]),
        row(lp["ffn_ln_g"]), row(lp["ffn_ln_b"]),
    ], axis=0))

    # misc vector slab (8, 128):
    # rows: 0=emb_ln_g 1=emb_ln_b 2=mlm_b(64) 3=proj_b 4=proj_ln_g 5=proj_ln_b 6,7=pad
    misc_vecs = jnp.concatenate([
        row(p["emb_ln_g"]), row(p["emb_ln_b"]), row(p["mlm_b"]),
        row(p["proj_b"]), row(p["proj_ln_g"]), row(p["proj_ln_b"]),
        jnp.zeros((2, 128), jnp.float32),
    ], axis=0)

    # head-weight slab (2*HIDDEN, VOCAB): rows [0:H) = mlm_w, rows [H:2H) = proj_w (lane-padded)
    head_w = jnp.concatenate([
        p["mlm_w"],
        jnp.pad(p["proj_w"], ((0, 0), (0, VOCAB - PROJ_DIM))),
    ], axis=0)

    # pos+type embeddings pre-tiled to (B*S, HIDDEN); token_type_ids = 0
    pos_type = jnp.tile(p["pos_emb"][:seq] + p["type_emb"][0][None, :], (batch, 1))

    return {
        "word_emb": p["word_emb"],
        "pos_type": pos_type,
        "wqkv": stack(lambda lp: jnp.concatenate([lp["q_w"], lp["k_w"], lp["v_w"]], axis=1)),
        "o_w": stack(lambda lp: lp["o_w"]),
        "i_w": stack(lambda lp: lp["i_w"]),
        "f_w": stack(lambda lp: lp["f_w"]),
        "layer_vecs": layer_vecs,
        "head_w": head_w,
        "misc_vecs": misc_vecs,
    }


# ---------------- model forward (one pallas_call) ----------------
def contrastive_bert_forward(params, input_ids, attention_mask, labels=None):
    B, S = input_ids.shape
    M = B * S
    pk = pack_params(params, B, S)

    ids2d = input_ids.reshape(M, 1).astype(jnp.int32)
    # HF-style additive attention mask, pre-shaped (B, 1, S) for broadcast over query rows
    mask3 = ((1.0 - attention_mask.astype(jnp.float32))
             * jnp.finfo(jnp.float32).min).reshape(B, 1, S)

    inputs = (
        ids2d, mask3, pk["word_emb"], pk["pos_type"],
        pk["wqkv"], pk["o_w"], pk["i_w"], pk["f_w"],
        pk["layer_vecs"], pk["head_w"], pk["misc_vecs"],
    )
    kernel = functools.partial(
        _fused_forward_kernel, batch=B, seq=S, n_heads=N_HEADS, head_dim=HEAD_DIM,
        n_layers=N_LAYERS, vocab=VOCAB, proj_dim=PROJ_DIM)

    # TODO(synk): for real B*S add a "parallel" row grid axis (v7x dual-TC) and
    # move word_emb/mlm_w to HBM (pl.ANY) with a row-gather + vocab-tiled MLM head.
    out = pl.pallas_call(
        kernel,
        out_shape=jax.ShapeDtypeStruct((M, OUT_LANES), jnp.float32),
        in_specs=[pl.BlockSpec(memory_space=pltpu.MemorySpace.VMEM) for _ in inputs],
        out_specs=pl.BlockSpec(memory_space=pltpu.MemorySpace.VMEM),
    )(*inputs)

    mlm_logits = out[:, :VOCAB].reshape(B, S, VOCAB)
    projected = out.reshape(B, S, OUT_LANES)[:, 0, VOCAB:VOCAB + PROJ_DIM]  # CLS rows
    if labels is not None:
        return projected, mlm_logits, labels
    return projected, mlm_logits


# ---------------- pure-JAX reference (semantics check) ----------------
def reference_forward(p, input_ids, attention_mask):
    B, S = input_ids.shape
    x = (p["word_emb"][input_ids] + p["pos_emb"][:S][None, :, :]
         + p["type_emb"][0][None, None, :])
    x = _layer_norm(x, p["emb_ln_g"], p["emb_ln_b"], LN_EPS_BERT)
    mask_add = ((1.0 - attention_mask.astype(jnp.float32))[:, None, None, :]
                * jnp.finfo(jnp.float32).min)
    for lp in p["layers"]:
        def split_heads(t):
            return t.reshape(B, S, N_HEADS, HEAD_DIM).transpose(0, 2, 1, 3)
        q = split_heads(x @ lp["q_w"] + lp["q_b"])
        k = split_heads(x @ lp["k_w"] + lp["k_b"])
        v = split_heads(x @ lp["v_w"] + lp["v_b"])
        s = jnp.einsum("bhqd,bhkd->bhqk", q, k) / math.sqrt(HEAD_DIM) + mask_add
        a = jax.nn.softmax(s, axis=-1)
        ctx = jnp.einsum("bhqk,bhkd->bhqd", a, v).transpose(0, 2, 1, 3).reshape(B, S, HIDDEN)
        x = _layer_norm(x + ctx @ lp["o_w"] + lp["o_b"],
                        lp["attn_ln_g"], lp["attn_ln_b"], LN_EPS_BERT)
        h = jax.nn.gelu(x @ lp["i_w"] + lp["i_b"], approximate=False)
        x = _layer_norm(x + h @ lp["f_w"] + lp["f_b"],
                        lp["ffn_ln_g"], lp["ffn_ln_b"], LN_EPS_BERT)
    mlm_logits = jax.nn.gelu(x, approximate=False) @ p["mlm_w"] + p["mlm_b"]
    cls = x[:, 0]
    projected = _layer_norm(cls @ p["proj_w"] + p["proj_b"],
                            p["proj_ln_g"], p["proj_ln_b"], LN_EPS_PROJ)
    return projected, mlm_logits


if __name__ == "__main__":
    key = jax.random.PRNGKey(0)
    pkey, ikey = jax.random.split(key)
    params = init_params(pkey)

    input_ids = jax.random.randint(ikey, (BATCH, SEQ), 0, VOCAB, dtype=jnp.int32)
    attention_mask = jnp.ones((BATCH, SEQ), jnp.int32).at[1, 6:].set(0)  # a little padding

    fwd = jax.jit(contrastive_bert_forward)
    projected, mlm_logits = fwd(params, input_ids, attention_mask)
    jax.block_until_ready((projected, mlm_logits))

    assert projected.shape == (BATCH, PROJ_DIM)
    assert mlm_logits.shape == (BATCH, SEQ, VOCAB)
    assert bool(jnp.all(jnp.isfinite(projected))) and bool(jnp.all(jnp.isfinite(mlm_logits)))

    ref_proj, ref_mlm = jax.jit(reference_forward)(params, input_ids, attention_mask)
    jax.block_until_ready((ref_proj, ref_mlm))
    assert bool(jnp.allclose(projected, ref_proj, atol=1e-2, rtol=1e-2))
    assert bool(jnp.allclose(mlm_logits, ref_mlm, atol=1e-2, rtol=1e-2))

    print("KERNEL_OK")
</pallas_src>

<mosaic_0001>
module attributes {stable_mosaic.version = 11 : i64} {
  func.func @_fused_forward_kernel(%arg0: memref<16x1xi32, #tpu.memory_space<vmem>>, %arg1: memref<2x1x8xf32, #tpu.memory_space<vmem>>, %arg2: memref<64x32xf32, #tpu.memory_space<vmem>>, %arg3: memref<16x32xf32, #tpu.memory_space<vmem>>, %arg4: memref<2x32x96xf32, #tpu.memory_space<vmem>>, %arg5: memref<2x32x32xf32, #tpu.memory_space<vmem>>, %arg6: memref<2x32x64xf32, #tpu.memory_space<vmem>>, %arg7: memref<2x64x32xf32, #tpu.memory_space<vmem>>, %arg8: memref<2x8x128xf32, #tpu.memory_space<vmem>>, %arg9: memref<64x64xf32, #tpu.memory_space<vmem>>, %arg10: memref<8x128xf32, #tpu.memory_space<vmem>>, %arg11: memref<16x128xf32, #tpu.memory_space<vmem>>) attributes {dimension_semantics = [], scalar_prefetch = 0 : i64, scratch_operands = 0 : i64, tpu.core_type = #tpu.core_type<tc>} {
    %c0 = arith.constant 0 : index
    %c0_0 = arith.constant 0 : index
    %0 = vector.load %arg10[%c0, %c0_0] : memref<8x128xf32, #tpu.memory_space<vmem>>, vector<8x128xf32>
    %c0_1 = arith.constant 0 : index
    %c0_2 = arith.constant 0 : index
    %1 = vector.load %arg0[%c0_1, %c0_2] : memref<16x1xi32, #tpu.memory_space<vmem>>, vector<16x1xi32>
    %2 = tpu.iota {dimensions = array<i32: 1>} : vector<16x64xi32>
    %3 = vector.broadcast %1 : vector<16x1xi32> to vector<16x64xi32>
    %4 = arith.cmpi eq, %2, %3 : vector<16x64xi32>
    %cst = arith.constant 1.000000e+00 : f32
    %cst_3 = arith.constant 0.000000e+00 : f32
    %5 = vector.broadcast %cst : f32 to vector<16x64xf32>
    %6 = vector.broadcast %cst_3 : f32 to vector<16x64xf32>
    %7 = arith.select %4, %5, %6 : vector<16x64xi1>, vector<16x64xf32>
    %c0_4 = arith.constant 0 : index
    %c0_5 = arith.constant 0 : index
    %8 = vector.load %arg2[%c0_4, %c0_5] : memref<64x32xf32, #tpu.memory_space<vmem>>, vector<64x32xf32>
    %cst_6 = arith.constant dense<0.000000e+00> : vector<16x32xf32>
    %9 = tpu.matmul %7, %8, %cst_6 {dimension_numbers = #tpu.dot_dimension_numbers<[1], [0], [0], [1], [0, 0, 1, 1], [], []>} : vector<16x64xf32>, vector<64x32xf32>, vector<16x32xf32> -> vector<16x32xf32>
    %c0_7 = arith.constant 0 : index
    %c0_8 = arith.constant 0 : index
    %10 = vector.load %arg3[%c0_7, %c0_8] : memref<16x32xf32, #tpu.memory_space<vmem>>, vector<16x32xf32>
    %11 = arith.addf %9, %10 : vector<16x32xf32>
    %12 = vector.extract_strided_slice %0 {offsets = [0, 0], sizes = [1, 32], strides = [1, 1]} : vector<8x128xf32> to vector<1x32xf32>
    %13 = vector.extract_strided_slice %0 {offsets = [1, 0], sizes = [1, 32], strides = [1, 1]} : vector<8x128xf32> to vector<1x32xf32>
    %cst_9 = arith.constant dense<0.000000e+00> : vector<16xf32>
    %14 = vector.multi_reduction <add>, %11, %cst_9 [1] : vector<16x32xf32> to vector<16xf32>
    %15 = vector.shape_cast %14 : vector<16xf32> to vector<16x1xf32>
    %cst_10 = arith.constant 3.200000e+01 : f32
    %16 = vector.broadcast %cst_10 : f32 to vector<16x1xf32>
    %17 = arith.divf %15, %16 : vector<16x1xf32>
    %18 = vector.broadcast %17 : vector<16x1xf32> to vector<16x32xf32>
    %19 = arith.subf %11, %18 : vector<16x32xf32>
    %20 = arith.mulf %19, %19 : vector<16x32xf32>
    %cst_11 = arith.constant dense<0.000000e+00> : vector<16xf32>
    %21 = vector.multi_reduction <add>, %20, %cst_11 [1] : vector<16x32xf32> to vector<16xf32>
    %22 = vector.shape_cast %21 : vector<16xf32> to vector<16x1xf32>
    %cst_12 = arith.constant 3.200000e+01 : f32
    %23 = vector.broadcast %cst_12 : f32 to vector<16x1xf32>
    %24 = arith.divf %22, %23 : vector<16x1xf32>
    %25 = vector.broadcast %17 : vector<16x1xf32> to vector<16x32xf32>
    %26 = arith.subf %11, %25 : vector<16x32xf32>
    %cst_13 = arith.constant 9.99999996E-13 : f32
    %27 = vector.broadcast %cst_13 : f32 to vector<16x1xf32>
    %28 = arith.addf %24, %27 : vector<16x1xf32>
    %29 = math.rsqrt %28 : vector<16x1xf32>
    %30 = vector.broadcast %29 : vector<16x1xf32> to vector<16x32xf32>
    %31 = arith.mulf %26, %30 : vector<16x32xf32>
    %32 = vector.broadcast %12 : vector<1x32xf32> to vector<16x32xf32>
    %33 = arith.mulf %31, %32 : vector<16x32xf32>
    %34 = vector.broadcast %13 : vector<1x32xf32> to vector<16x32xf32>
    %35 = arith.addf %33, %34 : vector<16x32xf32>
    %c0_14 = arith.constant 0 : index
    %c0_15 = arith.constant 0 : index
    %c0_16 = arith.constant 0 : index
    %36 = vector.load %arg1[%c0_14, %c0_15, %c0_16] : memref<2x1x8xf32, #tpu.memory_space<vmem>>, vector<2x1x8xf32>
    %c0_17 = arith.constant 0 : index
    %c0_18 = arith.constant 0 : index
    %c0_19 = arith.constant 0 : index
    %37 = vector.load %arg8[%c0_17, %c0_18, %c0_19] : memref<2x8x128xf32, #tpu.memory_space<vmem>>, vector<1x8x128xf32>
    %38 = vector.shape_cast %37 : vector<1x8x128xf32> to vector<8x128xf32>
    %c0_20 = arith.constant 0 : index
    %c0_21 = arith.constant 0 : index
    %c0_22 = arith.constant 0 : index
    %39 = vector.load %arg4[%c0_20, %c0_21, %c0_22] : memref<2x32x96xf32, #tpu.memory_space<vmem>>, vector<1x32x96xf32>
    %40 = vector.shape_cast %39 : vector<1x32x96xf32> to vector<32x96xf32>
    %cst_23 = arith.constant dense<0.000000e+00> : vector<16x96xf32>
    %41 = tpu.matmul %35, %40, %cst_23 {dimension_numbers = #tpu.dot_dimension_numbers<[1], [0], [0], [1], [0, 0, 1, 1], [], []>} : vector<16x32xf32>, vector<32x96xf32>, vector<16x96xf32> -> vector<16x96xf32>
    %42 = vector.extract_strided_slice %38 {offsets = [0, 0], sizes = [1, 96], strides = [1, 1]} : vector<8x128xf32> to vector<1x96xf32>
    %43 = vector.broadcast %42 : vector<1x96xf32> to vector<16x96xf32>
    %44 = arith.addf %41, %43 : vector<16x96xf32>
    %45 = vector.shape_cast %44 : vector<16x96xf32> to vector<2x8x96xf32>
    %46 = vector.extract_strided_slice %45 {offsets = [0, 0, 0], sizes = [2, 8, 16], strides = [1, 1, 1]} : vector<2x8x96xf32> to vector<2x8x16xf32>
    %47 = vector.extract_strided_slice %45 {offsets = [0, 0, 32], sizes = [2, 8, 16], strides = [1, 1, 1]} : vector<2x8x96xf32> to vector<2x8x16xf32>
    %48 = vector.extract_strided_slice %45 {offsets = [0, 0, 64], sizes = [2, 8, 16], strides = [1, 1, 1]} : vector<2x8x96xf32> to vector<2x8x16xf32>
    "tpu.trace_start"() <{level = 10 : i32, message = "bqd,bkd->bqk"}> : () -> ()
    %cst_24 = arith.constant dense<0.000000e+00> : vector<2x8x8xf32>
    %49 = tpu.matmul %46, %47, %cst_24 {dimension_numbers = #tpu.dot_dimension_numbers<[2], [2], [1], [1], [0, 0, 0, 1, 1, 1], [0], [0]>} : vector<2x8x16xf32>, vector<2x8x16xf32>, vector<2x8x8xf32> -> vector<2x8x8xf32>
    "tpu.trace_stop"() : () -> ()
    %cst_25 = arith.constant 2.500000e-01 : f32
    %50 = vector.broadcast %cst_25 : f32 to vector<2x8x8xf32>
    %51 = arith.mulf %49, %50 : vector<2x8x8xf32>
    %52 = vector.broadcast %36 : vector<2x1x8xf32> to vector<2x8x8xf32>
    %53 = arith.addf %51, %52 : vector<2x8x8xf32>
    %cst_26 = arith.constant dense<0xFF800000> : vector<2x8xf32>
    %54 = vector.multi_reduction <maximumf>, %53, %cst_26 [2] : vector<2x8x8xf32> to vector<2x8xf32>
    %55 = vector.shape_cast %54 : vector<2x8xf32> to vector<2x8x1xf32>
    %56 = vector.broadcast %55 : vector<2x8x1xf32> to vector<2x8x8xf32>
    %57 = arith.subf %53, %56 : vector<2x8x8xf32>
    %58 = math.exp %57 : vector<2x8x8xf32>
    %cst_27 = arith.constant dense<0.000000e+00> : vector<2x8xf32>
    %59 = vector.multi_reduction <add>, %58, %cst_27 [2] : vector<2x8x8xf32> to vector<2x8xf32>
    %60 = vector.shape_cast %59 : vector<2x8xf32> to vector<2x8x1xf32>
    %61 = tpu.reciprocal %60 {approx = true} : vector<2x8x1xf32> -> vector<2x8x1xf32>
    %62 = vector.broadcast %61 : vector<2x8x1xf32> to vector<2x8x8xf32>
    %63 = arith.mulf %58, %62 : vector<2x8x8xf32>
    "tpu.trace_start"() <{level = 10 : i32, message = "bqk,bkd->bqd"}> : () -> ()
    %cst_28 = arith.constant dense<0.000000e+00> : vector<2x8x16xf32>
    %64 = tpu.matmul %63, %48, %cst_28 {dimension_numbers = #tpu.dot_dimension_numbers<[2], [1], [1], [2], [0, 0, 0, 1, 1, 2], [0], [0]>} : vector<2x8x8xf32>, vector<2x8x16xf32>, vector<2x8x16xf32> -> vector<2x8x16xf32>
    "tpu.trace_stop"() : () -> ()
    %65 = vector.extract_strided_slice %45 {offsets = [0, 0, 16], sizes = [2, 8, 16], strides = [1, 1, 1]} : vector<2x8x96xf32> to vector<2x8x16xf32>
    %66 = vector.extract_strided_slice %45 {offsets = [0, 0, 48], sizes = [2, 8, 16], strides = [1, 1, 1]} : vector<2x8x96xf32> to vector<2x8x16xf32>
    %67 = vector.extract_strided_slice %45 {offsets = [0, 0, 80], sizes = [2, 8, 16], strides = [1, 1, 1]} : vector<2x8x96xf32> to vector<2x8x16xf32>
    "tpu.trace_start"() <{level = 10 : i32, message = "bqd,bkd->bqk"}> : () -> ()
    %cst_29 = arith.constant dense<0.000000e+00> : vector<2x8x8xf32>
    %68 = tpu.matmul %65, %66, %cst_29 {dimension_numbers = #tpu.dot_dimension_numbers<[2], [2], [1], [1], [0, 0, 0, 1, 1, 1], [0], [0]>} : vector<2x8x16xf32>, vector<2x8x16xf32>, vector<2x8x8xf32> -> vector<2x8x8xf32>
    "tpu.trace_stop"() : () -> ()
    %cst_30 = arith.constant 2.500000e-01 : f32
    %69 = vector.broadcast %cst_30 : f32 to vector<2x8x8xf32>
    %70 = arith.mulf %68, %69 : vector<2x8x8xf32>
    %71 = vector.broadcast %36 : vector<2x1x8xf32> to vector<2x8x8xf32>
    %72 = arith.addf %70, %71 : vector<2x8x8xf32>
    %cst_31 = arith.constant dense<0xFF800000> : vector<2x8xf32>
    %73 = vector.multi_reduction <maximumf>, %72, %cst_31 [2] : vector<2x8x8xf32> to vector<2x8xf32>
    %74 = vector.shape_cast %73 : vector<2x8xf32> to vector<2x8x1xf32>
    %75 = vector.broadcast %74 : vector<2x8x1xf32> to vector<2x8x8xf32>
    %76 = arith.subf %72, %75 : vector<2x8x8xf32>
    %77 = math.exp %76 : vector<2x8x8xf32>
    %cst_32 = arith.constant dense<0.000000e+00> : vector<2x8xf32>
    %78 = vector.multi_reduction <add>, %77, %cst_32 [2] : vector<2x8x8xf32> to vector<2x8xf32>
    %79 = vector.shape_cast %78 : vector<2x8xf32> to vector<2x8x1xf32>
    %80 = tpu.reciprocal %79 {approx = true} : vector<2x8x1xf32> -> vector<2x8x1xf32>
    %81 = vector.broadcast %80 : vector<2x8x1xf32> to vector<2x8x8xf32>
    %82 = arith.mulf %77, %81 : vector<2x8x8xf32>
    "tpu.trace_start"() <{level = 10 : i32, message = "bqk,bkd->bqd"}> : () -> ()
    %cst_33 = arith.constant dense<0.000000e+00> : vector<2x8x16xf32>
    %83 = tpu.matmul %82, %67, %cst_33 {dimension_numbers = #tpu.dot_dimension_numbers<[2], [1], [1], [2], [0, 0, 0, 1, 1, 2], [0], [0]>} : vector<2x8x8xf32>, vector<2x8x16xf32>, vector<2x8x16xf32> -> vector<2x8x16xf32>
    "tpu.trace_stop"() : () -> ()
    %84 = tpu.concatenate %64, %83 in 2 : vector<2x8x16xf32>, vector<2x8x16xf32> -> vector<2x8x32xf32>
    %85 = vector.shape_cast %84 : vector<2x8x32xf32> to vector<16x32xf32>
    %c0_34 = arith.constant 0 : index
    %c0_35 = arith.constant 0 : index
    %c0_36 = arith.constant 0 : index
    %86 = vector.load %arg5[%c0_34, %c0_35, %c0_36] : memref<2x32x32xf32, #tpu.memory_space<vmem>>, vector<1x32x32xf32>
    %87 = vector.shape_cast %86 : vector<1x32x32xf32> to vector<32x32xf32>
    %cst_37 = arith.constant dense<0.000000e+00> : vector<16x32xf32>
    %88 = tpu.matmul %85, %87, %cst_37 {dimension_numbers = #tpu.dot_dimension_numbers<[1], [0], [0], [1], [0, 0, 1, 1], [], []>} : vector<16x32xf32>, vector<32x32xf32>, vector<16x32xf32> -> vector<16x32xf32>
    %89 = vector.extract_strided_slice %38 {offsets = [1, 0], sizes = [1, 32], strides = [1, 1]} : vector<8x128xf32> to vector<1x32xf32>
    %90 = vector.broadcast %89 : vector<1x32xf32> to vector<16x32xf32>
    %91 = arith.addf %88, %90 : vector<16x32xf32>
    %92 = arith.addf %35, %91 : vector<16x32xf32>
    %93 = vector.extract_strided_slice %38 {offsets = [2, 0], sizes = [1, 32], strides = [1, 1]} : vector<8x128xf32> to vector<1x32xf32>
    %94 = vector.extract_strided_slice %38 {offsets = [3, 0], sizes = [1, 32], strides = [1, 1]} : vector<8x128xf32> to vector<1x32xf32>
    %cst_38 = arith.constant dense<0.000000e+00> : vector<16xf32>
    %95 = vector.multi_reduction <add>, %92, %cst_38 [1] : vector<16x32xf32> to vector<16xf32>
    %96 = vector.shape_cast %95 : vector<16xf32> to vector<16x1xf32>
    %cst_39 = arith.constant 3.200000e+01 : f32
    %97 = vector.broadcast %cst_39 : f32 to vector<16x1xf32>
    %98 = arith.divf %96, %97 : vector<16x1xf32>
    %99 = vector.broadcast %98 : vector<16x1xf32> to vector<16x32xf32>
    %100 = arith.subf %92, %99 : vector<16x32xf32>
    %101 = arith.mulf %100, %100 : vector<16x32xf32>
    %cst_40 = arith.constant dense<0.000000e+00> : vector<16xf32>
    %102 = vector.multi_reduction <add>, %101, %cst_40 [1] : vector<16x32xf32> to vector<16xf32>
    %103 = vector.shape_cast %102 : vector<16xf32> to vector<16x1xf32>
    %cst_41 = arith.constant 3.200000e+01 : f32
    %104 = vector.broadcast %cst_41 : f32 to vector<16x1xf32>
    %105 = arith.divf %103, %104 : vector<16x1xf32>
    %106 = vector.broadcast %98 : vector<16x1xf32> to vector<16x32xf32>
    %107 = arith.subf %92, %106 : vector<16x32xf32>
    %cst_42 = arith.constant 9.99999996E-13 : f32
    %108 = vector.broadcast %cst_42 : f32 to vector<16x1xf32>
    %109 = arith.addf %105, %108 : vector<16x1xf32>
    %110 = math.rsqrt %109 : vector<16x1xf32>
    %111 = vector.broadcast %110 : vector<16x1xf32> to vector<16x32xf32>
    %112 = arith.mulf %107, %111 : vector<16x32xf32>
    %113 = vector.broadcast %93 : vector<1x32xf32> to vector<16x32xf32>
    %114 = arith.mulf %112, %113 : vector<16x32xf32>
    %115 = vector.broadcast %94 : vector<1x32xf32> to vector<16x32xf32>
    %116 = arith.addf %114, %115 : vector<16x32xf32>
    %c0_43 = arith.constant 0 : index
    %c0_44 = arith.constant 0 : index
    %c0_45 = arith.constant 0 : index
    %117 = vector.load %arg6[%c0_43, %c0_44, %c0_45] : memref<2x32x64xf32, #tpu.memory_space<vmem>>, vector<1x32x64xf32>
    %118 = vector.shape_cast %117 : vector<1x32x64xf32> to vector<32x64xf32>
    %cst_46 = arith.constant dense<0.000000e+00> : vector<16x64xf32>
    %119 = tpu.matmul %116, %118, %cst_46 {dimension_numbers = #tpu.dot_dimension_numbers<[1], [0], [0], [1], [0, 0, 1, 1], [], []>} : vector<16x32xf32>, vector<32x64xf32>, vector<16x64xf32> -> vector<16x64xf32>
    %120 = vector.extract_strided_slice %38 {offsets = [4, 0], sizes = [1, 64], strides = [1, 1]} : vector<8x128xf32> to vector<1x64xf32>
    %121 = vector.broadcast %120 : vector<1x64xf32> to vector<16x64xf32>
    %122 = arith.addf %119, %121 : vector<16x64xf32>
    %cst_47 = arith.constant 5.000000e-01 : f32
    %123 = vector.broadcast %cst_47 : f32 to vector<16x64xf32>
    %124 = arith.mulf %123, %122 : vector<16x64xf32>
    %cst_48 = arith.constant 0.707106769 : f32
    %125 = vector.broadcast %cst_48 : f32 to vector<16x64xf32>
    %126 = arith.mulf %122, %125 : vector<16x64xf32>
    %cst_49 = arith.constant 0.000000e+00 : f32
    %127 = vector.broadcast %cst_49 : f32 to vector<16x64xf32>
    %128 = arith.cmpf oge, %126, %127 : vector<16x64xf32>
    %cst_50 = arith.constant 1.000000e+00 : f32
    %cst_51 = arith.constant -1.000000e+00 : f32
    %129 = vector.broadcast %cst_50 : f32 to vector<16x64xf32>
    %130 = vector.broadcast %cst_51 : f32 to vector<16x64xf32>
    %131 = arith.select %128, %129, %130 : vector<16x64xi1>, vector<16x64xf32>
    %132 = math.absf %126 : vector<16x64xf32>
    %cst_52 = arith.constant 0.327591091 : f32
    %133 = vector.broadcast %cst_52 : f32 to vector<16x64xf32>
    %134 = arith.mulf %133, %132 : vector<16x64xf32>
    %cst_53 = arith.constant 1.000000e+00 : f32
    %135 = vector.broadcast %cst_53 : f32 to vector<16x64xf32>
    %136 = arith.addf %135, %134 : vector<16x64xf32>
    %137 = tpu.reciprocal %136 : vector<16x64xf32> -> vector<16x64xf32>
    %cst_54 = arith.constant 1.06140542 : f32
    %138 = vector.broadcast %cst_54 : f32 to vector<16x64xf32>
    %139 = arith.mulf %138, %137 : vector<16x64xf32>
    %cst_55 = arith.constant -1.45315206 : f32
    %140 = vector.broadcast %cst_55 : f32 to vector<16x64xf32>
    %141 = arith.addf %139, %140 : vector<16x64xf32>
    %142 = arith.mulf %141, %137 : vector<16x64xf32>
    %cst_56 = arith.constant 1.42141378 : f32
    %143 = vector.broadcast %cst_56 : f32 to vector<16x64xf32>
    %144 = arith.addf %142, %143 : vector<16x64xf32>
    %145 = arith.mulf %144, %137 : vector<16x64xf32>
    %cst_57 = arith.constant -0.284496725 : f32
    %146 = vector.broadcast %cst_57 : f32 to vector<16x64xf32>
    %147 = arith.addf %145, %146 : vector<16x64xf32>
    %148 = arith.mulf %147, %137 : vector<16x64xf32>
    %cst_58 = arith.constant 0.254829586 : f32
    %149 = vector.broadcast %cst_58 : f32 to vector<16x64xf32>
    %150 = arith.addf %148, %149 : vector<16x64xf32>
    %151 = arith.mulf %150, %137 : vector<16x64xf32>
    %cst_59 = arith.constant 0.000000e+00 : f32
    %152 = vector.broadcast %cst_59 : f32 to vector<16x64xf32>
    %153 = arith.subf %152, %132 : vector<16x64xf32>
    %154 = arith.mulf %153, %132 : vector<16x64xf32>
    %155 = math.exp %154 : vector<16x64xf32>
    %156 = arith.mulf %151, %155 : vector<16x64xf32>
    %cst_60 = arith.constant 1.000000e+00 : f32
    %157 = vector.broadcast %cst_60 : f32 to vector<16x64xf32>
    %158 = arith.subf %157, %156 : vector<16x64xf32>
    %159 = arith.mulf %131, %158 : vector<16x64xf32>
    %cst_61 = arith.constant 1.000000e+00 : f32
    %160 = vector.broadcast %cst_61 : f32 to vector<16x64xf32>
    %161 = arith.addf %160, %159 : vector<16x64xf32>
    %162 = arith.mulf %124, %161 : vector<16x64xf32>
    %c0_62 = arith.constant 0 : index
    %c0_63 = arith.constant 0 : index
    %c0_64 = arith.constant 0 : index
    %163 = vector.load %arg7[%c0_62, %c0_63, %c0_64] : memref<2x64x32xf32, #tpu.memory_space<vmem>>, vector<1x64x32xf32>
    %164 = vector.shape_cast %163 : vector<1x64x32xf32> to vector<64x32xf32>
    %cst_65 = arith.constant dense<0.000000e+00> : vector<16x32xf32>
    %165 = tpu.matmul %162, %164, %cst_65 {dimension_numbers = #tpu.dot_dimension_numbers<[1], [0], [0], [1], [0, 0, 1, 1], [], []>} : vector<16x64xf32>, vector<64x32xf32>, vector<16x32xf32> -> vector<16x32xf32>
    %166 = vector.extract_strided_slice %38 {offsets = [5, 0], sizes = [1, 32], strides = [1, 1]} : vector<8x128xf32> to vector<1x32xf32>
    %167 = vector.broadcast %166 : vector<1x32xf32> to vector<16x32xf32>
    %168 = arith.addf %165, %167 : vector<16x32xf32>
    %169 = arith.addf %116, %168 : vector<16x32xf32>
    %170 = vector.extract_strided_slice %38 {offsets = [6, 0], sizes = [1, 32], strides = [1, 1]} : vector<8x128xf32> to vector<1x32xf32>
    %171 = vector.extract_strided_slice %38 {offsets = [7, 0], sizes = [1, 32], strides = [1, 1]} : vector<8x128xf32> to vector<1x32xf32>
    %cst_66 = arith.constant dense<0.000000e+00> : vector<16xf32>
    %172 = vector.multi_reduction <add>, %169, %cst_66 [1] : vector<16x32xf32> to vector<16xf32>
    %173 = vector.shape_cast %172 : vector<16xf32> to vector<16x1xf32>
    %cst_67 = arith.constant 3.200000e+01 : f32
    %174 = vector.broadcast %cst_67 : f32 to vector<16x1xf32>
    %175 = arith.divf %173, %174 : vector<16x1xf32>
    %176 = vector.broadcast %175 : vector<16x1xf32> to vector<16x32xf32>
    %177 = arith.subf %169, %176 : vector<16x32xf32>
    %178 = arith.mulf %177, %177 : vector<16x32xf32>
    %cst_68 = arith.constant dense<0.000000e+00> : vector<16xf32>
    %179 = vector.multi_reduction <add>, %178, %cst_68 [1] : vector<16x32xf32> to vector<16xf32>
    %180 = vector.shape_cast %179 : vector<16xf32> to vector<16x1xf32>
    %cst_69 = arith.constant 3.200000e+01 : f32
    %181 = vector.broadcast %cst_69 : f32 to vector<16x1xf32>
    %182 = arith.divf %180, %181 : vector<16x1xf32>
    %183 = vector.broadcast %175 : vector<16x1xf32> to vector<16x32xf32>
    %184 = arith.subf %169, %183 : vector<16x32xf32>
    %cst_70 = arith.constant 9.99999996E-13 : f32
    %185 = vector.broadcast %cst_70 : f32 to vector<16x1xf32>
    %186 = arith.addf %182, %185 : vector<16x1xf32>
    %187 = math.rsqrt %186 : vector<16x1xf32>
    %188 = vector.broadcast %187 : vector<16x1xf32> to vector<16x32xf32>
    %189 = arith.mulf %184, %188 : vector<16x32xf32>
    %190 = vector.broadcast %170 : vector<1x32xf32> to vector<16x32xf32>
    %191 = arith.mulf %189, %190 : vector<16x32xf32>
    %192 = vector.broadcast %171 : vector<1x32xf32> to vector<16x32xf32>
    %193 = arith.addf %191, %192 : vector<16x32xf32>
    %c1 = arith.constant 1 : index
    %c0_71 = arith.constant 0 : index
    %c0_72 = arith.constant 0 : index
    %194 = vector.load %arg8[%c1, %c0_71, %c0_72] : memref<2x8x128xf32, #tpu.memory_space<vmem>>, vector<1x8x128xf32>
    %195 = vector.shape_cast %194 : vector<1x8x128xf32> to vector<8x128xf32>
    %c1_73 = arith.constant 1 : index
    %c0_74 = arith.constant 0 : index
    %c0_75 = arith.constant 0 : index
    %196 = vector.load %arg4[%c1_73, %c0_74, %c0_75] : memref<2x32x96xf32, #tpu.memory_space<vmem>>, vector<1x32x96xf32>
    %197 = vector.shape_cast %196 : vector<1x32x96xf32> to vector<32x96xf32>
    %cst_76 = arith.constant dense<0.000000e+00> : vector<16x96xf32>
    %198 = tpu.matmul %193, %197, %cst_76 {dimension_numbers = #tpu.dot_dimension_numbers<[1], [0], [0], [1], [0, 0, 1, 1], [], []>} : vector<16x32xf32>, vector<32x96xf32>, vector<16x96xf32> -> vector<16x96xf32>
    %199 = vector.extract_strided_slice %195 {offsets = [0, 0], sizes = [1, 96], strides = [1, 1]} : vector<8x128xf32> to vector<1x96xf32>
    %200 = vector.broadcast %199 : vector<1x96xf32> to vector<16x96xf32>
    %201 = arith.addf %198, %200 : vector<16x96xf32>
    %202 = vector.shape_cast %201 : vector<16x96xf32> to vector<2x8x96xf32>
    %203 = vector.extract_strided_slice %202 {offsets = [0, 0, 0], sizes = [2, 8, 16], strides = [1, 1, 1]} : vector<2x8x96xf32> to vector<2x8x16xf32>
    %204 = vector.extract_strided_slice %202 {offsets = [0, 0, 32], sizes = [2, 8, 16], strides = [1, 1, 1]} : vector<2x8x96xf32> to vector<2x8x16xf32>
    %205 = vector.extract_strided_slice %202 {offsets = [0, 0, 64], sizes = [2, 8, 16], strides = [1, 1, 1]} : vector<2x8x96xf32> to vector<2x8x16xf32>
    "tpu.trace_start"() <{level = 10 : i32, message = "bqd,bkd->bqk"}> : () -> ()
    %cst_77 = arith.constant dense<0.000000e+00> : vector<2x8x8xf32>
    %206 = tpu.matmul %203, %204, %cst_77 {dimension_numbers = #tpu.dot_dimension_numbers<[2], [2], [1], [1], [0, 0, 0, 1, 1, 1], [0], [0]>} : vector<2x8x16xf32>, vector<2x8x16xf32>, vector<2x8x8xf32> -> vector<2x8x8xf32>
    "tpu.trace_stop"() : () -> ()
    %cst_78 = arith.constant 2.500000e-01 : f32
    %207 = vector.broadcast %cst_78 : f32 to vector<2x8x8xf32>
    %208 = arith.mulf %206, %207 : vector<2x8x8xf32>
    %209 = vector.broadcast %36 : vector<2x1x8xf32> to vector<2x8x8xf32>
    %210 = arith.addf %208, %209 : vector<2x8x8xf32>
    %cst_79 = arith.constant dense<0xFF800000> : vector<2x8xf32>
    %211 = vector.multi_reduction <maximumf>, %210, %cst_79 [2] : vector<2x8x8xf32> to vector<2x8xf32>
    %212 = vector.shape_cast %211 : vector<2x8xf32> to vector<2x8x1xf32>
    %213 = vector.broadcast %212 : vector<2x8x1xf32> to vector<2x8x8xf32>
    %214 = arith.subf %210, %213 : vector<2x8x8xf32>
    %215 = math.exp %214 : vector<2x8x8xf32>
    %cst_80 = arith.constant dense<0.000000e+00> : vector<2x8xf32>
    %216 = vector.multi_reduction <add>, %215, %cst_80 [2] : vector<2x8x8xf32> to vector<2x8xf32>
    %217 = vector.shape_cast %216 : vector<2x8xf32> to vector<2x8x1xf32>
    %218 = tpu.reciprocal %217 {approx = true} : vector<2x8x1xf32> -> vector<2x8x1xf32>
    %219 = vector.broadcast %218 : vector<2x8x1xf32> to vector<2x8x8xf32>
    %220 = arith.mulf %215, %219 : vector<2x8x8xf32>
    "tpu.trace_start"() <{level = 10 : i32, message = "bqk,bkd->bqd"}> : () -> ()
    %cst_81 = arith.constant dense<0.000000e+00> : vector<2x8x16xf32>
    %221 = tpu.matmul %220, %205, %cst_81 {dimension_numbers = #tpu.dot_dimension_numbers<[2], [1], [1], [2], [0, 0, 0, 1, 1, 2], [0], [0]>} : vector<2x8x8xf32>, vector<2x8x16xf32>, vector<2x8x16xf32> -> vector<2x8x16xf32>
    "tpu.trace_stop"() : () -> ()
    %222 = vector.extract_strided_slice %202 {offsets = [0, 0, 16], sizes = [2, 8, 16], strides = [1, 1, 1]} : vector<2x8x96xf32> to vector<2x8x16xf32>
    %223 = vector.extract_strided_slice %202 {offsets = [0, 0, 48], sizes = [2, 8, 16], strides = [1, 1, 1]} : vector<2x8x96xf32> to vector<2x8x16xf32>
    %224 = vector.extract_strided_slice %202 {offsets = [0, 0, 80], sizes = [2, 8, 16], strides = [1, 1, 1]} : vector<2x8x96xf32> to vector<2x8x16xf32>
    "tpu.trace_start"() <{level = 10 : i32, message = "bqd,bkd->bqk"}> : () -> ()
    %cst_82 = arith.constant dense<0.000000e+00> : vector<2x8x8xf32>
    %225 = tpu.matmul %222, %223, %cst_82 {dimension_numbers = #tpu.dot_dimension_numbers<[2], [2], [1], [1], [0, 0, 0, 1, 1, 1], [0], [0]>} : vector<2x8x16xf32>, vector<2x8x16xf32>, vector<2x8x8xf32> -> vector<2x8x8xf32>
    "tpu.trace_stop"() : () -> ()
    %cst_83 = arith.constant 2.500000e-01 : f32
    %226 = vector.broadcast %cst_83 : f32 to vector<2x8x8xf32>
    %227 = arith.mulf %225, %226 : vector<2x8x8xf32>
    %228 = vector.broadcast %36 : vector<2x1x8xf32> to vector<2x8x8xf32>
    %229 = arith.addf %227, %228 : vector<2x8x8xf32>
    %cst_84 = arith.constant dense<0xFF800000> : vector<2x8xf32>
    %230 = vector.multi_reduction <maximumf>, %229, %cst_84 [2] : vector<2x8x8xf32> to vector<2x8xf32>
    %231 = vector.shape_cast %230 : vector<2x8xf32> to vector<2x8x1xf32>
    %232 = vector.broadcast %231 : vector<2x8x1xf32> to vector<2x8x8xf32>
    %233 = arith.subf %229, %232 : vector<2x8x8xf32>
    %234 = math.exp %233 : vector<2x8x8xf32>
    %cst_85 = arith.constant dense<0.000000e+00> : vector<2x8xf32>
    %235 = vector.multi_reduction <add>, %234, %cst_85 [2] : vector<2x8x8xf32> to vector<2x8xf32>
    %236 = vector.shape_cast %235 : vector<2x8xf32> to vector<2x8x1xf32>
    %237 = tpu.reciprocal %236 {approx = true} : vector<2x8x1xf32> -> vector<2x8x1xf32>
    %238 = vector.broadcast %237 : vector<2x8x1xf32> to vector<2x8x8xf32>
    %239 = arith.mulf %234, %238 : vector<2x8x8xf32>
    "tpu.trace_start"() <{level = 10 : i32, message = "bqk,bkd->bqd"}> : () -> ()
    %cst_86 = arith.constant dense<0.000000e+00> : vector<2x8x16xf32>
    %240 = tpu.matmul %239, %224, %cst_86 {dimension_numbers = #tpu.dot_dimension_numbers<[2], [1], [1], [2], [0, 0, 0, 1, 1, 2], [0], [0]>} : vector<2x8x8xf32>, vector<2x8x16xf32>, vector<2x8x16xf32> -> vector<2x8x16xf32>
    "tpu.trace_stop"() : () -> ()
    %241 = tpu.concatenate %221, %240 in 2 : vector<2x8x16xf32>, vector<2x8x16xf32> -> vector<2x8x32xf32>
    %242 = vector.shape_cast %241 : vector<2x8x32xf32> to vector<16x32xf32>
    %c1_87 = arith.constant 1 : index
    %c0_88 = arith.constant 0 : index
    %c0_89 = arith.constant 0 : index
    %243 = vector.load %arg5[%c1_87, %c0_88, %c0_89] : memref<2x32x32xf32, #tpu.memory_space<vmem>>, vector<1x32x32xf32>
    %244 = vector.shape_cast %243 : vector<1x32x32xf32> to vector<32x32xf32>
    %cst_90 = arith.constant dense<0.000000e+00> : vector<16x32xf32>
    %245 = tpu.matmul %242, %244, %cst_90 {dimension_numbers = #tpu.dot_dimension_numbers<[1], [0], [0], [1], [0, 0, 1, 1], [], []>} : vector<16x32xf32>, vector<32x32xf32>, vector<16x32xf32> -> vector<16x32xf32>
    %246 = vector.extract_strided_slice %195 {offsets = [1, 0], sizes = [1, 32], strides = [1, 1]} : vector<8x128xf32> to vector<1x32xf32>
    %247 = vector.broadcast %246 : vector<1x32xf32> to vector<16x32xf32>
    %248 = arith.addf %245, %247 : vector<16x32xf32>
    %249 = arith.addf %193, %248 : vector<16x32xf32>
    %250 = vector.extract_strided_slice %195 {offsets = [2, 0], sizes = [1, 32], strides = [1, 1]} : vector<8x128xf32> to vector<1x32xf32>
    %251 = vector.extract_strided_slice %195 {offsets = [3, 0], sizes = [1, 32], strides = [1, 1]} : vector<8x128xf32> to vector<1x32xf32>
    %cst_91 = arith.constant dense<0.000000e+00> : vector<16xf32>
    %252 = vector.multi_reduction <add>, %249, %cst_91 [1] : vector<16x32xf32> to vector<16xf32>
    %253 = vector.shape_cast %252 : vector<16xf32> to vector<16x1xf32>
    %cst_92 = arith.constant 3.200000e+01 : f32
    %254 = vector.broadcast %cst_92 : f32 to vector<16x1xf32>
    %255 = arith.divf %253, %254 : vector<16x1xf32>
    %256 = vector.broadcast %255 : vector<16x1xf32> to vector<16x32xf32>
    %257 = arith.subf %249, %256 : vector<16x32xf32>
    %258 = arith.mulf %257, %257 : vector<16x32xf32>
    %cst_93 = arith.constant dense<0.000000e+00> : vector<16xf32>
    %259 = vector.multi_reduction <add>, %258, %cst_93 [1] : vector<16x32xf32> to vector<16xf32>
    %260 = vector.shape_cast %259 : vector<16xf32> to vector<16x1xf32>
    %cst_94 = arith.constant 3.200000e+01 : f32
    %261 = vector.broadcast %cst_94 : f32 to vector<16x1xf32>
    %262 = arith.divf %260, %261 : vector<16x1xf32>
    %263 = vector.broadcast %255 : vector<16x1xf32> to vector<16x32xf32>
    %264 = arith.subf %249, %263 : vector<16x32xf32>
    %cst_95 = arith.constant 9.99999996E-13 : f32
    %265 = vector.broadcast %cst_95 : f32 to vector<16x1xf32>
    %266 = arith.addf %262, %265 : vector<16x1xf32>
    %267 = math.rsqrt %266 : vector<16x1xf32>
    %268 = vector.broadcast %267 : vector<16x1xf32> to vector<16x32xf32>
    %269 = arith.mulf %264, %268 : vector<16x32xf32>
    %270 = vector.broadcast %250 : vector<1x32xf32> to vector<16x32xf32>
    %271 = arith.mulf %269, %270 : vector<16x32xf32>
    %272 = vector.broadcast %251 : vector<1x32xf32> to vector<16x32xf32>
    %273 = arith.addf %271, %272 : vector<16x32xf32>
    %c1_96 = arith.constant 1 : index
    %c0_97 = arith.constant 0 : index
    %c0_98 = arith.constant 0 : index
    %274 = vector.load %arg6[%c1_96, %c0_97, %c0_98] : memref<2x32x64xf32, #tpu.memory_space<vmem>>, vector<1x32x64xf32>
    %275 = vector.shape_cast %274 : vector<1x32x64xf32> to vector<32x64xf32>
    %cst_99 = arith.constant dense<0.000000e+00> : vector<16x64xf32>
    %276 = tpu.matmul %273, %275, %cst_99 {dimension_numbers = #tpu.dot_dimension_numbers<[1], [0], [0], [1], [0, 0, 1, 1], [], []>} : vector<16x32xf32>, vector<32x64xf32>, vector<16x64xf32> -> vector<16x64xf32>
    %277 = vector.extract_strided_slice %195 {offsets = [4, 0], sizes = [1, 64], strides = [1, 1]} : vector<8x128xf32> to vector<1x64xf32>
    %278 = vector.broadcast %277 : vector<1x64xf32> to vector<16x64xf32>
    %279 = arith.addf %276, %278 : vector<16x64xf32>
    %cst_100 = arith.constant 5.000000e-01 : f32
    %280 = vector.broadcast %cst_100 : f32 to vector<16x64xf32>
    %281 = arith.mulf %280, %279 : vector<16x64xf32>
    %cst_101 = arith.constant 0.707106769 : f32
    %282 = vector.broadcast %cst_101 : f32 to vector<16x64xf32>
    %283 = arith.mulf %279, %282 : vector<16x64xf32>
    %cst_102 = arith.constant 0.000000e+00 : f32
    %284 = vector.broadcast %cst_102 : f32 to vector<16x64xf32>
    %285 = arith.cmpf oge, %283, %284 : vector<16x64xf32>
    %cst_103 = arith.constant 1.000000e+00 : f32
    %cst_104 = arith.constant -1.000000e+00 : f32
    %286 = vector.broadcast %cst_103 : f32 to vector<16x64xf32>
    %287 = vector.broadcast %cst_104 : f32 to vector<16x64xf32>
    %288 = arith.select %285, %286, %287 : vector<16x64xi1>, vector<16x64xf32>
    %289 = math.absf %283 : vector<16x64xf32>
    %cst_105 = arith.constant 0.327591091 : f32
    %290 = vector.broadcast %cst_105 : f32 to vector<16x64xf32>
    %291 = arith.mulf %290, %289 : vector<16x64xf32>
    %cst_106 = arith.constant 1.000000e+00 : f32
    %292 = vector.broadcast %cst_106 : f32 to vector<16x64xf32>
    %293 = arith.addf %292, %291 : vector<16x64xf32>
    %294 = tpu.reciprocal %293 : vector<16x64xf32> -> vector<16x64xf32>
    %cst_107 = arith.constant 1.06140542 : f32
    %295 = vector.broadcast %cst_107 : f32 to vector<16x64xf32>
    %296 = arith.mulf %295, %294 : vector<16x64xf32>
    %cst_108 = arith.constant -1.45315206 : f32
    %297 = vector.broadcast %cst_108 : f32 to vector<16x64xf32>
    %298 = arith.addf %296, %297 : vector<16x64xf32>
    %299 = arith.mulf %298, %294 : vector<16x64xf32>
    %cst_109 = arith.constant 1.42141378 : f32
    %300 = vector.broadcast %cst_109 : f32 to vector<16x64xf32>
    %301 = arith.addf %299, %300 : vector<16x64xf32>
    %302 = arith.mulf %301, %294 : vector<16x64xf32>
    %cst_110 = arith.constant -0.284496725 : f32
    %303 = vector.broadcast %cst_110 : f32 to vector<16x64xf32>
    %304 = arith.addf %302, %303 : vector<16x64xf32>
    %305 = arith.mulf %304, %294 : vector<16x64xf32>
    %cst_111 = arith.constant 0.254829586 : f32
    %306 = vector.broadcast %cst_111 : f32 to vector<16x64xf32>
    %307 = arith.addf %305, %306 : vector<16x64xf32>
    %308 = arith.mulf %307, %294 : vector<16x64xf32>
    %cst_112 = arith.constant 0.000000e+00 : f32
    %309 = vector.broadcast %cst_112 : f32 to vector<16x64xf32>
    %310 = arith.subf %309, %289 : vector<16x64xf32>
    %311 = arith.mulf %310, %289 : vector<16x64xf32>
    %312 = math.exp %311 : vector<16x64xf32>
    %313 = arith.mulf %308, %312 : vector<16x64xf32>
    %cst_113 = arith.constant 1.000000e+00 : f32
    %314 = vector.broadcast %cst_113 : f32 to vector<16x64xf32>
    %315 = arith.subf %314, %313 : vector<16x64xf32>
    %316 = arith.mulf %288, %315 : vector<16x64xf32>
    %cst_114 = arith.constant 1.000000e+00 : f32
    %317 = vector.broadcast %cst_114 : f32 to vector<16x64xf32>
    %318 = arith.addf %317, %316 : vector<16x64xf32>
    %319 = arith.mulf %281, %318 : vector<16x64xf32>
    %c1_115 = arith.constant 1 : index
    %c0_116 = arith.constant 0 : index
    %c0_117 = arith.constant 0 : index
    %320 = vector.load %arg7[%c1_115, %c0_116, %c0_117] : memref<2x64x32xf32, #tpu.memory_space<vmem>>, vector<1x64x32xf32>
    %321 = vector.shape_cast %320 : vector<1x64x32xf32> to vector<64x32xf32>
    %cst_118 = arith.constant dense<0.000000e+00> : vector<16x32xf32>
    %322 = tpu.matmul %319, %321, %cst_118 {dimension_numbers = #tpu.dot_dimension_numbers<[1], [0], [0], [1], [0, 0, 1, 1], [], []>} : vector<16x64xf32>, vector<64x32xf32>, vector<16x32xf32> -> vector<16x32xf32>
    %323 = vector.extract_strided_slice %195 {offsets = [5, 0], sizes = [1, 32], strides = [1, 1]} : vector<8x128xf32> to vector<1x32xf32>
    %324 = vector.broadcast %323 : vector<1x32xf32> to vector<16x32xf32>
    %325 = arith.addf %322, %324 : vector<16x32xf32>
    %326 = arith.addf %273, %325 : vector<16x32xf32>
    %327 = vector.extract_strided_slice %195 {offsets = [6, 0], sizes = [1, 32], strides = [1, 1]} : vector<8x128xf32> to vector<1x32xf32>
    %328 = vector.extract_strided_slice %195 {offsets = [7, 0], sizes = [1, 32], strides = [1, 1]} : vector<8x128xf32> to vector<1x32xf32>
    %cst_119 = arith.constant dense<0.000000e+00> : vector<16xf32>
    %329 = vector.multi_reduction <add>, %326, %cst_119 [1] : vector<16x32xf32> to vector<16xf32>
    %330 = vector.shape_cast %329 : vector<16xf32> to vector<16x1xf32>
    %cst_120 = arith.constant 3.200000e+01 : f32
    %331 = vector.broadcast %cst_120 : f32 to vector<16x1xf32>
    %332 = arith.divf %330, %331 : vector<16x1xf32>
    %333 = vector.broadcast %332 : vector<16x1xf32> to vector<16x32xf32>
    %334 = arith.subf %326, %333 : vector<16x32xf32>
    %335 = arith.mulf %334, %334 : vector<16x32xf32>
    %cst_121 = arith.constant dense<0.000000e+00> : vector<16xf32>
    %336 = vector.multi_reduction <add>, %335, %cst_121 [1] : vector<16x32xf32> to vector<16xf32>
    %337 = vector.shape_cast %336 : vector<16xf32> to vector<16x1xf32>
    %cst_122 = arith.constant 3.200000e+01 : f32
    %338 = vector.broadcast %cst_122 : f32 to vector<16x1xf32>
    %339 = arith.divf %337, %338 : vector<16x1xf32>
    %340 = vector.broadcast %332 : vector<16x1xf32> to vector<16x32xf32>
    %341 = arith.subf %326, %340 : vector<16x32xf32>
    %cst_123 = arith.constant 9.99999996E-13 : f32
    %342 = vector.broadcast %cst_123 : f32 to vector<16x1xf32>
    %343 = arith.addf %339, %342 : vector<16x1xf32>
    %344 = math.rsqrt %343 : vector<16x1xf32>
    %345 = vector.broadcast %344 : vector<16x1xf32> to vector<16x32xf32>
    %346 = arith.mulf %341, %345 : vector<16x32xf32>
    %347 = vector.broadcast %327 : vector<1x32xf32> to vector<16x32xf32>
    %348 = arith.mulf %346, %347 : vector<16x32xf32>
    %349 = vector.broadcast %328 : vector<1x32xf32> to vector<16x32xf32>
    %350 = arith.addf %348, %349 : vector<16x32xf32>
    %c0_124 = arith.constant 0 : index
    %c0_125 = arith.constant 0 : index
    %351 = vector.load %arg9[%c0_124, %c0_125] : memref<64x64xf32, #tpu.memory_space<vmem>>, vector<64x64xf32>
    %cst_126 = arith.constant 5.000000e-01 : f32
    %352 = vector.broadcast %cst_126 : f32 to vector<16x32xf32>
    %353 = arith.mulf %352, %350 : vector<16x32xf32>
    %cst_127 = arith.constant 0.707106769 : f32
    %354 = vector.broadcast %cst_127 : f32 to vector<16x32xf32>
    %355 = arith.mulf %350, %354 : vector<16x32xf32>
    %cst_128 = arith.constant 0.000000e+00 : f32
    %356 = vector.broadcast %cst_128 : f32 to vector<16x32xf32>
    %357 = arith.cmpf oge, %355, %356 : vector<16x32xf32>
    %cst_129 = arith.constant 1.000000e+00 : f32
    %cst_130 = arith.constant -1.000000e+00 : f32
    %358 = vector.broadcast %cst_129 : f32 to vector<16x32xf32>
    %359 = vector.broadcast %cst_130 : f32 to vector<16x32xf32>
    %360 = arith.select %357, %358, %359 : vector<16x32xi1>, vector<16x32xf32>
    %361 = math.absf %355 : vector<16x32xf32>
    %cst_131 = arith.constant 0.327591091 : f32
    %362 = vector.broadcast %cst_131 : f32 to vector<16x32xf32>
    %363 = arith.mulf %362, %361 : vector<16x32xf32>
    %cst_132 = arith.constant 1.000000e+00 : f32
    %364 = vector.broadcast %cst_132 : f32 to vector<16x32xf32>
    %365 = arith.addf %364, %363 : vector<16x32xf32>
    %366 = tpu.reciprocal %365 : vector<16x32xf32> -> vector<16x32xf32>
    %cst_133 = arith.constant 1.06140542 : f32
    %367 = vector.broadcast %cst_133 : f32 to vector<16x32xf32>
    %368 = arith.mulf %367, %366 : vector<16x32xf32>
    %cst_134 = arith.constant -1.45315206 : f32
    %369 = vector.broadcast %cst_134 : f32 to vector<16x32xf32>
    %370 = arith.addf %368, %369 : vector<16x32xf32>
    %371 = arith.mulf %370, %366 : vector<16x32xf32>
    %cst_135 = arith.constant 1.42141378 : f32
    %372 = vector.broadcast %cst_135 : f32 to vector<16x32xf32>
    %373 = arith.addf %371, %372 : vector<16x32xf32>
    %374 = arith.mulf %373, %366 : vector<16x32xf32>
    %cst_136 = arith.constant -0.284496725 : f32
    %375 = vector.broadcast %cst_136 : f32 to vector<16x32xf32>
    %376 = arith.addf %374, %375 : vector<16x32xf32>
    %377 = arith.mulf %376, %366 : vector<16x32xf32>
    %cst_137 = arith.constant 0.254829586 : f32
    %378 = vector.broadcast %cst_137 : f32 to vector<16x32xf32>
    %379 = arith.addf %377, %378 : vector<16x32xf32>
    %380 = arith.mulf %379, %366 : vector<16x32xf32>
    %cst_138 = arith.constant 0.000000e+00 : f32
    %381 = vector.broadcast %cst_138 : f32 to vector<16x32xf32>
    %382 = arith.subf %381, %361 : vector<16x32xf32>
    %383 = arith.mulf %382, %361 : vector<16x32xf32>
    %384 = math.exp %383 : vector<16x32xf32>
    %385 = arith.mulf %380, %384 : vector<16x32xf32>
    %cst_139 = arith.constant 1.000000e+00 : f32
    %386 = vector.broadcast %cst_139 : f32 to vector<16x32xf32>
    %387 = arith.subf %386, %385 : vector<16x32xf32>
    %388 = arith.mulf %360, %387 : vector<16x32xf32>
    %cst_140 = arith.constant 1.000000e+00 : f32
    %389 = vector.broadcast %cst_140 : f32 to vector<16x32xf32>
    %390 = arith.addf %389, %388 : vector<16x32xf32>
    %391 = arith.mulf %353, %390 : vector<16x32xf32>
    %392 = vector.extract_strided_slice %351 {offsets = [0, 0], sizes = [32, 64], strides = [1, 1]} : vector<64x64xf32> to vector<32x64xf32>
    %cst_141 = arith.constant dense<0.000000e+00> : vector<16x64xf32>
    %393 = tpu.matmul %391, %392, %cst_141 {dimension_numbers = #tpu.dot_dimension_numbers<[1], [0], [0], [1], [0, 0, 1, 1], [], []>} : vector<16x32xf32>, vector<32x64xf32>, vector<16x64xf32> -> vector<16x64xf32>
    %394 = vector.extract_strided_slice %0 {offsets = [2, 0], sizes = [1, 64], strides = [1, 1]} : vector<8x128xf32> to vector<1x64xf32>
    %395 = vector.broadcast %394 : vector<1x64xf32> to vector<16x64xf32>
    %396 = arith.addf %393, %395 : vector<16x64xf32>
    %397 = vector.extract_strided_slice %351 {offsets = [32, 0], sizes = [32, 16], strides = [1, 1]} : vector<64x64xf32> to vector<32x16xf32>
    %cst_142 = arith.constant dense<0.000000e+00> : vector<16x16xf32>
    %398 = tpu.matmul %350, %397, %cst_142 {dimension_numbers = #tpu.dot_dimension_numbers<[1], [0], [0], [1], [0, 0, 1, 1], [], []>} : vector<16x32xf32>, vector<32x16xf32>, vector<16x16xf32> -> vector<16x16xf32>
    %399 = vector.extract_strided_slice %0 {offsets = [3, 0], sizes = [1, 16], strides = [1, 1]} : vector<8x128xf32> to vector<1x16xf32>
    %400 = vector.broadcast %399 : vector<1x16xf32> to vector<16x16xf32>
    %401 = arith.addf %398, %400 : vector<16x16xf32>
    %402 = vector.extract_strided_slice %0 {offsets = [4, 0], sizes = [1, 16], strides = [1, 1]} : vector<8x128xf32> to vector<1x16xf32>
    %403 = vector.extract_strided_slice %0 {offsets = [5, 0], sizes = [1, 16], strides = [1, 1]} : vector<8x128xf32> to vector<1x16xf32>
    %cst_143 = arith.constant dense<0.000000e+00> : vector<16xf32>
    %404 = vector.multi_reduction <add>, %401, %cst_143 [1] : vector<16x16xf32> to vector<16xf32>
    %405 = vector.shape_cast %404 : vector<16xf32> to vector<16x1xf32>
    %cst_144 = arith.constant 1.600000e+01 : f32
    %406 = vector.broadcast %cst_144 : f32 to vector<16x1xf32>
    %407 = arith.divf %405, %406 : vector<16x1xf32>
    %408 = vector.broadcast %407 : vector<16x1xf32> to vector<16x16xf32>
    %409 = arith.subf %401, %408 : vector<16x16xf32>
    %410 = arith.mulf %409, %409 : vector<16x16xf32>
    %cst_145 = arith.constant dense<0.000000e+00> : vector<16xf32>
    %411 = vector.multi_reduction <add>, %410, %cst_145 [1] : vector<16x16xf32> to vector<16xf32>
    %412 = vector.shape_cast %411 : vector<16xf32> to vector<16x1xf32>
    %cst_146 = arith.constant 1.600000e+01 : f32
    %413 = vector.broadcast %cst_146 : f32 to vector<16x1xf32>
    %414 = arith.divf %412, %413 : vector<16x1xf32>
    %415 = vector.broadcast %407 : vector<16x1xf32> to vector<16x16xf32>
    %416 = arith.subf %401, %415 : vector<16x16xf32>
    %cst_147 = arith.constant 9.99999974E-6 : f32
    %417 = vector.broadcast %cst_147 : f32 to vector<16x1xf32>
    %418 = arith.addf %414, %417 : vector<16x1xf32>
    %419 = math.rsqrt %418 : vector<16x1xf32>
    %420 = vector.broadcast %419 : vector<16x1xf32> to vector<16x16xf32>
    %421 = arith.mulf %416, %420 : vector<16x16xf32>
    %422 = vector.broadcast %402 : vector<1x16xf32> to vector<16x16xf32>
    %423 = arith.mulf %421, %422 : vector<16x16xf32>
    %424 = vector.broadcast %403 : vector<1x16xf32> to vector<16x16xf32>
    %425 = arith.addf %423, %424 : vector<16x16xf32>
    %cst_148 = arith.constant 0.000000e+00 : f32
    %426 = vector.broadcast %cst_148 : f32 to vector<16x48xf32>
    %427 = tpu.concatenate %396, %425, %426 in 1 : vector<16x64xf32>, vector<16x16xf32>, vector<16x48xf32> -> vector<16x128xf32>
    %c0_149 = arith.constant 0 : index
    %c0_150 = arith.constant 0 : index
    %428 = vector.load %arg11[%c0_149, %c0_150] : memref<16x128xf32, #tpu.memory_space<vmem>>, vector<16x128xf32>
    tpu.vector_store %arg11[%c0_149, %c0_150], %427 {strides = array<i32>} : memref<16x128xf32, #tpu.memory_space<vmem>>, vector<16x128xf32>,
    return
  }
}

</mosaic_0001>

<bundles_post_ra>
// kernel: contrastive_bert_forward.1
= control target key start
LH: loop header
LB: loop body
LE: loop exit
PB: predicated region body
PF: predicated region fallthrough
CT: control target
= control target key end

     0   :  { %v1767_v0 = vmov 0   ;;  %v41_v11 = vlaneseq  ;;  %vm63_vm0 = vcmask 523264   ;;  %v1768_v14 = vmov 0.0   ;;  %s1770_s12 = smov 96   ;;  %s1771_s13 = smov 80   ;;  %s2325_s0 = inlined_call_operand.vmem [shape: s32[16,1], index: 0, kind: input, shape index: {}]   ;;  %s2326_s2 = inlined_call_operand.vmem [shape: f32[64,32], index: 2, kind: input, shape index: {}]   ;;  %s2327_s3 = inlined_call_operand.vmem [shape: f32[16,32], index: 3, kind: input, shape index: {}]   ;;  %s2328_s4 = inlined_call_operand.vmem [shape: f32[2,32,96], index: 4, kind: input, shape index: {}]   ;;  %s2329_s10 = inlined_call_operand.vmem [shape: f32[8,128], index: 10, kind: input, shape index: {}]   ;;  %s2330_s8 = inlined_call_operand.vmem [shape: f32[2,8,128], index: 8, kind: input, shape index: {}]   ;;  %s2331_s1 = inlined_call_operand.vmem [shape: f32[2,1,8], index: 1, kind: input, shape index: {}]   ;;  %s2332_s5 = inlined_call_operand.vmem [shape: f32[2,32,32], index: 5, kind: input, shape index: {}]   ;;  %s2333_s6 = inlined_call_operand.vmem [shape: f32[2,32,64], index: 6, kind: input, shape index: {}]   ;;  %s2334_s7 = inlined_call_operand.vmem [shape: f32[2,64,32], index: 7, kind: input, shape index: {}]   ;;  %s2335_s9 = inlined_call_operand.vmem [shape: f32[64,64], index: 9, kind: input, shape index: {}]   ;;  %s2336_s11 = inlined_call_operand.vmem [shape: f32[16,128], index: 11, kind: output, shape index: {}]  }
   0x1   :  { %1664 = vset.pattern.permute.xlu0 %v1767_v0  ;;  %v39_v1 = vld [vmem:[%s2325_s0] sm:$0xff]  ;;  %v60_v2 = vld [vmem:[%s2326_s2 + $0x38] sm:$0xff]  ;;  %v59_v3 = vld [vmem:[%s2326_s2 + $0x30] sm:$0xff]  ;;  %vm93_vm3 = vcmask 261120   ;;  %v1769_v26 = vmov 32.0   ;;  %s1772_s14 = smov 112  }
   0x2   :  { %44 = vperm.xlu0 %1664, %v39_v1   ;;  %78 = vmatpush.msra.mxu0 %v60_v2  ;;  %v58_v4 = vld [vmem:[%s2326_s2 + $0x28] sm:$0xff]  ;;  %v57_v5 = vld [vmem:[%s2326_s2 + $0x20] sm:$0xff]  ;;  %v56_v7 = vld [vmem:[%s2326_s2 + $0x18] sm:$0xff]  ;;  %v42_v12 = vand.u32 127, %v41_v11  ;;  %1682 = vrcp.f32 %v1769_v26  ;;  %vm191_vm11 = vcmask 130048   ;;  %vm253_vm12 = vcmask 64512  }
   0x3   :  { %v40_v6 = vld [vmem:[%s2325_s0 + $0x8] sm:$0xff]  ;;  %v55_v8 = vld [vmem:[%s2326_s2 + $0x10] sm:$0xff]  ;;  %v53_v10 = vld [vmem:[%s2326_s2] sm:$0xff]  ;;  %s1773_s18 = smov 64   ;;  %s1775_s23 = smov 16  }
   0x4   :  { %79 = vmatpush.msra.mxu0 %v59_v3  ;;  %v54_v9 = vld [vmem:[%s2326_s2 + $0x8] sm:$0xff]  ;;  %v61_v18 = vld [vmem:[%s2327_s3] sm:$0xff]  ;;  %v157_v43 = vld [vmem:[%s2328_s4 + $0x18] sm:$0xff] }
   0x5   :  { %v62_v22 = vld [vmem:[%s2327_s3 + $0x8] sm:$0xff]  ;;  %177 = vmatpush.msra.mxu1 %v157_v43  ;;  %v156_v44 = vld [vmem:[%s2328_s4 + $0x10] sm:$0xff]  ;;  %v154_v46 = vld [vmem:[%s2328_s4] sm:$0xff] }
   0x6   :  { %80 = vmatpush.msra.mxu0 %v58_v4  ;;  %v155_v45 = vld [vmem:[%s2328_s4 + $0x8] sm:$0xff]  ;;  %v38_v58 = vld [vmem:[%s2329_s10] sm:$0xff] }
   0x7   :  { %178 = vmatpush.msra.mxu1 %v156_v44  ;;  %v145_v62 = vperm.slane %v38_v58, 0  ;;  %v148_v2 = vperm.slane %v38_v58, 1 }
   0x8   :  { %81 = vmatpush.msra.mxu0 %v57_v5  ;;  %v1683_v27 = vpop.eup %1682 }
   0x9   :  { %v101_v28 = vmul.f32 32.0, %v1683_v27  ;;  %vm105_vm4 = vweird.f32 %v1683_v27  ;;  %179 = vmatpush.msra.mxu1 %v155_v45 }
   0xa   :  { %47 = vperm.xlu0 %1664, %v40_v6   ;;  %82 = vmatpush.msra.mxu0 %v56_v7 }
   0xb   :  { %v102_v29 = vsub.f32 1.0, %v101_v28  ;;  %180 = vmatpush.msra.mxu1 %v154_v46 }
   0xc   :  { %83 = vmatpush.msra.mxu0 %v55_v8 }
   0xd   :  { %v103_v30 = vmul.f32 %v1683_v27, %v102_v29 }
   0xe   :  { %84 = vmatpush.msra.mxu0 %v54_v9 }
   0xf   :  { %v104_v31 = vadd.f32 %v1683_v27, %v103_v30 }
  0x10   :  { %85 = vmatpush.msra.mxu0 %v53_v10 }
  0x11   :  { %v1878_v32 = vsel %vm105_vm4, %v1683_v27, %v104_v31 }
  0x74   :  { %v45_v13 = vpop.permute.xlu0 %44 }
  0x75   :  { %vm49_vm1 = vcmp.eq.s32.totalorder %v42_v12, %v45_v13 }
  0x76   :  { %v51_v15 = vsel %vm49_vm1, 1.0, %v1768_v14 }
  0x77   :  { %1586 = vmatmul.msk.f32.vlgmr.msra.gmra.mxu0 %vm63_vm0, %v51_v15 }
  0x7c   :  { %v48_v16 = vpop.permute.xlu0 %47 }
  0x7d   :  { %vm50_vm2 = vcmp.eq.s32.totalorder %v42_v12, %v48_v16  ;;  %v1912_v12 = vld [vmem:[%s2330_s8] sm:$0xff] }
  0x7e   :  { %v52_v17 = vsel %vm50_vm2, 1.0, %v1768_v14  ;;  %v158_v13 = vperm.slane %v1912_v12, 0 }
  0x7f   :  { %1587 = vmatmul.msk.f32.gmra.mxu0 %vm63_vm0, %v52_v17 }
  0xf4   :  { %v87_v19 = vpop.f32.mrf.mxu0 }
  0xf5   :  { %v88_v20 = vadd.f32 %v87_v19, %v61_v18 }
  0xf7   :  { %v94_v21 = vsel %vm93_vm3, %v88_v20, 0.0 }
  0xf8   :  { %95 = vadd.xlane.f32.xlu1 %v94_v21 }
  0xfc   :  { %v90_v23 = vpop.f32.mrf.mxu0 }
  0xfd   :  { %v91_v24 = vadd.f32 %v90_v23, %v62_v22 }
  0xff   :  { %v97_v25 = vsel %vm93_vm3, %v91_v24, 0.0 }
 0x100   :  { %98 = vadd.xlane.f32.xlu1 %v97_v25  ;;  %v1934_v25 = vld [vmem:[%s2331_s1 + $0x1] ss:$0 sm:$0xff] }
 0x16b   :  { %v96_v33 = vpop.xlane.xlu1 %95 }
 0x16c   :  { %v107_v34 = vmul.f32 %v1878_v32, %v96_v33 }
 0x16e   :  { %v109_v35 = vsub.f32 %v88_v20, %v107_v34  ;;  %v1927_v20 = vld [vmem:[%s2331_s1] ss:$0 sm:$0xff]  ;;  %s1774_s1 = smov 48  }
 0x170   :  { %v111_v36 = vmul.f32 %v109_v35, %v109_v35 }
 0x172   :  { %v113_v37 = vsel %vm93_vm3, %v111_v36, 0.0 }
 0x173   :  { %114 = vadd.xlane.f32.xlu2 %v113_v37  ;;  %v99_v38 = vpop.xlane.xlu1 %98 }
 0x174   :  { %v108_v39 = vmul.f32 %v1878_v32, %v99_v38 }
 0x176   :  { %v110_v40 = vsub.f32 %v91_v24, %v108_v39 }
 0x178   :  { %v112_v41 = vmul.f32 %v110_v40, %v110_v40 }
 0x17a   :  { %v116_v42 = vsel %vm93_vm3, %v112_v41, 0.0 }
 0x17b   :  { %117 = vadd.xlane.f32.xlu2 %v116_v42 }
 0x1e6   :  { %v115_v47 = vpop.xlane.xlu2 %114 }
 0x1e7   :  { %v119_v48 = vmul.f32 %v115_v47, %v1878_v32 }
 0x1e9   :  { %v121_v49 = vadd.f32 1e-12, %v119_v48 }
 0x1eb   :  { %1684 = vrsqrt.f32 %v121_v49  ;;  %vm129_vm6 = vweird.f32 %v121_v49 }
 0x1ee   :  { %v118_v50 = vpop.xlane.xlu2 %117 }
 0x1ef   :  { %v120_v51 = vmul.f32 %v118_v50, %v1878_v32 }
 0x1f1   :  { %v1685_v52 = vpop.eup %1684  ;;  %v122_v53 = vadd.f32 1e-12, %v120_v51 }
 0x1f2   :  { %v124_v54 = vmul.f32 %v1685_v52, %v121_v49  ;;  %vm130_vm5 = vweird.f32 %v1685_v52 }
 0x1f3   :  { %1686 = vrsqrt.f32 %v122_v53  ;;  %vm131_vm7 = vmor %vm129_vm6, %vm130_vm5  ;;  %vm139_vm9 = vweird.f32 %v122_v53 }
 0x1f4   :  { %v125_v55 = vmul.f32 %v1685_v52, %v124_v54 }
 0x1f6   :  { %v126_v56 = vmul.f32 0.5, %v125_v55 }
 0x1f8   :  { %v127_v57 = vsub.f32 1.5, %v126_v56 }
 0x1f9   :  { %v1687_v59 = vpop.eup %1686 }
 0x1fa   :  { %v128_v60 = vmul.f32 %v1685_v52, %v127_v57  ;;  %v134_v61 = vmul.f32 %v1687_v59, %v122_v53  ;;  %vm140_vm8 = vweird.f32 %v1687_v59 }
 0x1fb   :  { %vm141_vm10 = vmor %vm139_vm9, %vm140_vm8 }
 0x1fc   :  { %v132_v63 = vsel %vm131_vm7, %v1685_v52, %v128_v60  ;;  %v135_v0 = vmul.f32 %v1687_v59, %v134_v61 }
 0x1fd   :  { %v143_v1 = vmul.f32 %v132_v63, %v109_v35 }
 0x1fe   :  { %v136_v3 = vmul.f32 0.5, %v135_v0 }
 0x1ff   :  { %v146_v4 = vmul.f32 %v145_v62, %v143_v1 }
 0x200   :  { %v137_v5 = vsub.f32 1.5, %v136_v3 }
 0x201   :  { %v1901_v6 = vadd.f32 %v148_v2, %v146_v4 }
 0x202   :  { %v138_v7 = vmul.f32 %v1687_v59, %v137_v5 }
 0x203   :  { %1588 = vmatmul.msk.f32.vlgmr.msra.gmra.mxu1 %vm93_vm3, %v1901_v6 }
 0x204   :  { %v142_v8 = vsel %vm141_vm10, %v1687_v59, %v138_v7 }
 0x205   :  { %v144_v9 = vmul.f32 %v142_v8, %v110_v40 }
 0x207   :  { %v147_v10 = vmul.f32 %v145_v62, %v144_v9 }
 0x209   :  { %v1905_v11 = vadd.f32 %v148_v2, %v147_v10 }
 0x20b   :  { %1589 = vmatmul.msk.f32.gmra.mxu1 %vm93_vm3, %v1905_v11 }
 0x280   :  { %v182_v14 = vpop.f32.mrf.mxu1 }
 0x281   :  { %v183_v15 = vadd.f32 %v182_v14, %v158_v13 }
 0x283   :  { %189 = vrot.lane.b32.xlu1 %v183_v15, %s1770_s12 }
 0x288   :  { %v185_v16 = vpop.f32.mrf.mxu1 }
 0x289   :  { %v186_v17 = vadd.f32 %v185_v16, %v158_v13 }
 0x28b   :  { %330 = vrot.lane.b32.xlu1 %v183_v15, %s1771_s13  ;;  %217 = vrot.lane.b32.xlu0 %v186_v17, %s1770_s12  ;;  %v1938_v30 = vpack.i.bf16 %v186_v17, %v183_v15 }
 0x293   :  { %358 = vrot.lane.b32.xlu1 %v186_v17, %s1771_s13 }
 0x29b   :  { %328 = vrot.lane.b32.xlu1 %v183_v15, %s1772_s14 }
 0x2f5   :  { %v190_v18 = vpop.permute.xlu1 %189 }
 0x2f6   :  { %1590 = vmatpush.xpose.msk.msrb.mxu0 %vm191_vm11, %v190_v18 }
 0x2f9   :  { %1591 = vmatmul.msk.f32.vlgmr.msrb.gmra.mxu0 %vm191_vm11, %v183_v15 }
 0x2fd   :  { %v218_v19 = vpop.permute.xlu0 %217  ;;  %v331_v33 = vpop.permute.xlu1 %330 }
 0x2fe   :  { %1592 = vmatpush.xpose.msk.msra.mxu3 %vm191_vm11, %v218_v19 }
 0x301   :  { %1593 = vmatmul.msk.f32.vlgmr.msra.gmra.mxu3 %vm191_vm11, %v186_v17 }
 0x305   :  { %v359_v40 = vpop.permute.xlu1 %358 }
 0x30d   :  { %v329_v51 = vpop.permute.xlu1 %328 }
 0x376   :  { %v213_v21 = vpop.f32.mrf.mxu0 }
 0x377   :  { %v243_v22 = vmul.f32 0.25, %v213_v21 }
 0x379   :  { %v251_v23 = vadd.f32 %v1927_v20, %v243_v22 }
 0x37b   :  { %v254_v24 = vsel %vm253_vm12, %v251_v23, -inf }
 0x37c   :  { %255 = vmax.xlane.f32.xlu2 %v254_v24  ;;  %v475_v24 = vld [vmem:[%s2332_s5 + $0x18] sm:$0xff] }
 0x384   :  { %v240_v26 = vpop.f32.mrf.mxu3 }
 0x385   :  { %v244_v27 = vmul.f32 0.25, %v240_v26  ;;  %v474_v26 = vld [vmem:[%s2332_s5 + $0x10] sm:$0xff] }
 0x387   :  { %v252_v28 = vadd.f32 %v1934_v25, %v244_v27  ;;  %v473_v27 = vld [vmem:[%s2332_s5 + $0x8] sm:$0xff] }
 0x389   :  { %v257_v29 = vsel %vm253_vm12, %v252_v28, -inf }
 0x38a   :  { %258 = vmax.xlane.f32.xlu0 %v257_v29 }
 0x394   :  { %1666 = vrot.lane.b32.xlu2 %v1938_v30, %s1773_s18 }
 0x3ef   :  { %v256_v31 = vpop.xlane.xlu2 %255 }
 0x3f0   :  { %v260_v34 = vsub.f32 %v251_v23, %v256_v31 }
 0x3f2   :  { %v262_v35 = vmul.f32 1.442695, %v260_v34 }
 0x3f4   :  { %1688 = vpow2.f32 %v262_v35 }
 0x3f7   :  { %v1667_v36 = vpop.permute.xlu2 %1666 }
 0x3f8   :  { %v1668_v37 = vunpack.i.l.bf16 %v1667_v36  ;;  %v1669_v38 = vunpack.i.h.bf16 %v1667_v36  ;;  %v476_v36 = vperm.slane %v1912_v12, 1 }
 0x3fa   :  { %v1689_v39 = vpop.eup %1688  ;;  %297 = vmatpush.msra.mxu2 %v1668_v37  ;;  %323 = vmatpush.msrb.mxu3 %v1669_v38 }
 0x3fb   :  { %v266_v41 = vsel %vm253_vm12, %v1689_v39, 0.0 }
 0x3fc   :  { %1596 = vmatpush.xpose.msk.msrb.mxu2 %vm191_vm11, %v331_v33  ;;  %1598 = vmatpush.xpose.msk.msra.mxu3 %vm191_vm11, %v359_v40 }
 0x3fd   :  { %267 = vadd.xlane.f32.xlu2 %v266_v41  ;;  %v259_v42 = vpop.xlane.xlu0 %258 }
 0x3fe   :  { %v261_v43 = vsub.f32 %v252_v28, %v259_v42 }
 0x400   :  { %v264_v44 = vmul.f32 1.442695, %v261_v43 }
 0x402   :  { %1690 = vpow2.f32 %v264_v44 }
 0x408   :  { %v1691_v45 = vpop.eup %1690 }
 0x409   :  { %v269_v46 = vsel %vm253_vm12, %v1691_v45, 0.0 }
 0x40a   :  { %270 = vadd.xlane.f32.xlu2 %v269_v46 }
 0x422   :  { %356 = vrot.lane.b32.xlu2 %v186_v17, %s1772_s14 }
 0x470   :  { %v268_v47 = vpop.xlane.xlu2 %267 }
 0x471   :  { %1692 = vrcp.f32 %v268_v47 }
 0x477   :  { %v1693_v48 = vpop.eup %1692 }
 0x478   :  { %v274_v49 = vmul.f32 %v1693_v48, %v1689_v39 }
 0x47a   :  { %1594 = vmatmul.msk.f32.vlgmr.msra.gmra.mxu2 %vm253_vm12, %v274_v49 }
 0x47d   :  { %v271_v50 = vpop.xlane.xlu2 %270 }
 0x47e   :  { %1694 = vrcp.f32 %v271_v50 }
 0x482   :  { %1597 = vmatmul.msk.f32.vlgmr.msrb.gmra.mxu2 %vm191_vm11, %v329_v51 }
 0x484   :  { %v1695_v52 = vpop.eup %1694 }
 0x485   :  { %v275_v53 = vmul.f32 %v1695_v52, %v1691_v45  ;;  %v357_v54 = vpop.permute.xlu2 %356 }
 0x487   :  { %1595 = vmatmul.msk.f32.vlgmr.msrb.gmra.mxu3 %vm253_vm12, %v275_v53 }
 0x488   :  { %495 = vmatpush.msrb.mxu3 %v475_v24 }
 0x48a   :  { %496 = vmatpush.msrb.mxu3 %v474_v26  ;;  %v562_v26 = vperm.slane %v1912_v12, 4 }
 0x48c   :  { %497 = vmatpush.msrb.mxu3 %v473_v27 }
 0x48f   :  { %1599 = vmatmul.msk.f32.vlgmr.msra.gmra.mxu3 %vm191_vm11, %v357_v54  ;;  %v560_v54 = vld [vmem:[%s2333_s6 + $0x10] sm:$0xff] }
 0x4fd   :  { %v299_v55 = vpop.f32.mrf.mxu2 }
 0x505   :  { %v353_v56 = vpop.f32.mrf.mxu2 }
 0x506   :  { %v384_v57 = vmul.f32 0.25, %v353_v56  ;;  %v558_v56 = vld [vmem:[%s2333_s6] sm:$0xff] }
 0x508   :  { %v386_v58 = vadd.f32 %v1927_v20, %v384_v57 }
 0x50a   :  { %v388_v59 = vsel %vm253_vm12, %v386_v58, -inf  ;;  %v325_v60 = vpop.f32.mrf.mxu3 }
 0x50b   :  { %389 = vmax.xlane.f32.xlu1 %v388_v59 }
 0x512   :  { %v381_v61 = vpop.f32.mrf.mxu3 }
 0x513   :  { %v385_v62 = vmul.f32 0.25, %v381_v61 }
 0x515   :  { %v387_v63 = vadd.f32 %v1934_v25, %v385_v62 }
 0x517   :  { %v391_v0 = vsel %vm253_vm12, %v387_v63, -inf }
 0x518   :  { %392 = vmax.xlane.f32.xlu0 %v391_v0 }
 0x57e   :  { %v390_v1 = vpop.xlane.xlu1 %389 }
 0x57f   :  { %v394_v2 = vsub.f32 %v386_v58, %v390_v1 }
 0x581   :  { %v396_v3 = vmul.f32 1.442695, %v394_v2 }
 0x583   :  { %1696 = vpow2.f32 %v396_v3 }
 0x589   :  { %v1697_v4 = vpop.eup %1696 }
 0x58a   :  { %v400_v5 = vsel %vm253_vm12, %v1697_v4, 0.0 }
 0x58b   :  { %401 = vadd.xlane.f32.xlu2 %v400_v5  ;;  %v393_v7 = vpop.xlane.xlu0 %392 }
 0x58c   :  { %v395_v8 = vsub.f32 %v387_v63, %v393_v7 }
 0x58e   :  { %v398_v9 = vmul.f32 1.442695, %v395_v8  ;;  %v552_v8 = vperm.slane %v1912_v12, 2 }
 0x590   :  { %1698 = vpow2.f32 %v398_v9 }
 0x596   :  { %v1699_v10 = vpop.eup %1698 }
 0x597   :  { %v403_v13 = vsel %vm253_vm12, %v1699_v10, 0.0 }
 0x598   :  { %404 = vadd.xlane.f32.xlu0 %v403_v13 }
 0x5ac   :  { %1671 = vrot.lane.b32.xlu0 %v1938_v30, %s1774_s1  ;;  %v472_v30 = vld [vmem:[%s2332_s5] sm:$0xff] }
 0x5ad   :  { %498 = vmatpush.msrb.mxu3 %v472_v30 }
 0x5fe   :  { %v402_v14 = vpop.xlane.xlu2 %401 }
 0x5ff   :  { %1700 = vrcp.f32 %v402_v14  ;;  %v555_v14 = vperm.slane %v1912_v12, 3 }
 0x605   :  { %v1701_v16 = vpop.eup %1700 }
 0x606   :  { %v408_v23 = vmul.f32 %v1701_v16, %v1697_v4 }
 0x60b   :  { %v405_v15 = vpop.xlane.xlu0 %404 }
 0x60c   :  { %1702 = vrcp.f32 %v405_v15 }
 0x612   :  { %v1703_v17 = vpop.eup %1702 }
 0x613   :  { %v409_v22 = vmul.f32 %v1703_v17, %v1699_v10 }
 0x61e   :  { %v1672_v18 = vpop.permute.xlu0 %1671 }
 0x61f   :  { %v1674_v19 = vunpack.i.h.bf16 %v1672_v18  ;;  %v1673_v21 = vunpack.i.l.bf16 %v1672_v18 }
 0x621   :  { %431 = vmatpush.msrb.mxu1 %v1673_v21  ;;  %457 = vmatpush.msra.mxu2 %v1674_v19 }
 0x622   :  { %1600 = vmatmul.msk.f32.vlgmr.msrb.gmra.mxu1 %vm253_vm12, %v408_v23  ;;  %1601 = vmatmul.msk.f32.vlgmr.msra.gmra.mxu2 %vm253_vm12, %v409_v22 }
 0x69f   :  { %v433_v28 = vpop.f32.mrf.mxu1 }
 0x6a0   :  { %464 = vrot.lane.b32.xlu0 %v433_v28, %s1775_s23 }
 0x6a5   :  { %v459_v29 = vpop.f32.mrf.mxu2 }
 0x6a6   :  { %466 = vrot.lane.b32.xlu1 %v459_v29, %s1775_s23 }
 0x712   :  { %v465_v31 = vpop.permute.xlu0 %464 }
 0x713   :  { %v470_v33 = vsel %vm191_vm11, %v299_v55, %v465_v31  ;;  %v559_v55 = vld [vmem:[%s2333_s6 + $0x8] sm:$0xff] }
 0x714   :  { %1602 = vmatmul.msk.f32.vlgmr.msrb.gmra.mxu3 %vm93_vm3, %v470_v33 }
 0x718   :  { %v467_v34 = vpop.permute.xlu1 %466 }
 0x719   :  { %v471_v35 = vsel %vm191_vm11, %v325_v60, %v467_v34 }
 0x71c   :  { %1603 = vmatmul.msk.f32.gmra.mxu3 %vm93_vm3, %v471_v35 }
 0x797   :  { %v500_v37 = vpop.f32.mrf.mxu3 }
 0x798   :  { %v501_v38 = vadd.f32 %v500_v37, %v476_v36 }
 0x79a   :  { %v506_v39 = vadd.f32 %v501_v38, %v1901_v6  ;;  %v676_v38 = vld [vmem:[%s2334_s7 + $0x30] sm:$0xff] }
 0x79c   :  { %v508_v40 = vsel %vm93_vm3, %v506_v39, 0.0 }
 0x79d   :  { %509 = vadd.xlane.f32.xlu0 %v508_v40  ;;  %v675_v40 = vld [vmem:[%s2334_s7 + $0x28] sm:$0xff] }
 0x79f   :  { %v503_v41 = vpop.f32.mrf.mxu3 }
 0x7a0   :  { %v504_v42 = vadd.f32 %v503_v41, %v476_v36  ;;  %v677_v36 = vld [vmem:[%s2334_s7 + $0x38] sm:$0xff] }
 0x7a2   :  { %v507_v43 = vadd.f32 %v504_v42, %v1905_v11  ;;  %v561_v11 = vld [vmem:[%s2333_s6 + $0x18] sm:$0xff]  ;;  %v674_v42 = vld [vmem:[%s2334_s7 + $0x20] sm:$0xff] }
 0x7a3   :  { %581 = vmatpush.msra.mxu1 %v561_v11 }
 0x7a4   :  { %v511_v44 = vsel %vm93_vm3, %v507_v43, 0.0 }
 0x7a5   :  { %512 = vadd.xlane.f32.xlu2 %v511_v44  ;;  %582 = vmatpush.msra.mxu1 %v560_v54 }
 0x7a7   :  { %583 = vmatpush.msra.mxu1 %v559_v55 }
 0x7a9   :  { %584 = vmatpush.msra.mxu1 %v558_v56 }
 0x7ab   :  { %693 = vmatpush.msrb.mxu1 %v677_v36 }
 0x7ad   :  { %694 = vmatpush.msrb.mxu1 %v676_v38  ;;  %v1776_v38 = vmov -1.0  }
 0x7af   :  { %695 = vmatpush.msrb.mxu1 %v675_v40 }
 0x7b1   :  { %696 = vmatpush.msrb.mxu1 %v674_v42 }
 0x810   :  { %v510_v45 = vpop.xlane.xlu0 %509 }
 0x811   :  { %v514_v46 = vmul.f32 %v510_v45, %v1878_v32 }
 0x813   :  { %v516_v47 = vsub.f32 %v506_v39, %v514_v46  ;;  %v673_v46 = vld [vmem:[%s2334_s7 + $0x18] sm:$0xff] }
 0x814   :  { %697 = vmatpush.msrb.mxu1 %v673_v46 }
 0x815   :  { %v518_v48 = vmul.f32 %v516_v47, %v516_v47 }
 0x817   :  { %v520_v49 = vsel %vm93_vm3, %v518_v48, 0.0  ;;  %v672_v48 = vld [vmem:[%s2334_s7 + $0x10] sm:$0xff] }
 0x818   :  { %521 = vadd.xlane.f32.xlu2 %v520_v49  ;;  %v513_v50 = vpop.xlane.xlu2 %512  ;;  %698 = vmatpush.msrb.mxu1 %v672_v48 }
 0x819   :  { %v515_v6 = vmul.f32 %v513_v50, %v1878_v32 }
 0x81b   :  { %v517_v51 = vsub.f32 %v507_v43, %v515_v6 }
 0x81d   :  { %v519_v52 = vmul.f32 %v517_v51, %v517_v51 }
 0x81f   :  { %v523_v53 = vsel %vm93_vm3, %v519_v52, 0.0  ;;  %v670_v52 = vld [vmem:[%s2334_s7] sm:$0xff] }
 0x820   :  { %524 = vadd.xlane.f32.xlu2 %v523_v53 }
 0x88b   :  { %v522_v57 = vpop.xlane.xlu2 %521 }
 0x88c   :  { %v526_v58 = vmul.f32 %v522_v57, %v1878_v32 }
 0x88e   :  { %v528_v59 = vadd.f32 1e-12, %v526_v58 }
 0x890   :  { %1704 = vrsqrt.f32 %v528_v59  ;;  %vm536_vm14 = vweird.f32 %v528_v59 }
 0x893   :  { %v525_v60 = vpop.xlane.xlu2 %524 }
 0x894   :  { %v527_v61 = vmul.f32 %v525_v60, %v1878_v32 }
 0x896   :  { %v1705_v62 = vpop.eup %1704  ;;  %v529_v63 = vadd.f32 1e-12, %v527_v61 }
 0x897   :  { %v531_v0 = vmul.f32 %v1705_v62, %v528_v59  ;;  %vm537_vm13 = vweird.f32 %v1705_v62 }
 0x898   :  { %1706 = vrsqrt.f32 %v529_v63  ;;  %vm538_vm15 = vmor %vm536_vm14, %vm537_vm13  ;;  %vm546_vm2 = vweird.f32 %v529_v63 }
 0x899   :  { %v532_v1 = vmul.f32 %v1705_v62, %v531_v0 }
 0x89b   :  { %v533_v2 = vmul.f32 0.5, %v532_v1 }
 0x89d   :  { %v534_v3 = vsub.f32 1.5, %v533_v2 }
 0x89e   :  { %v1707_v4 = vpop.eup %1706 }
 0x89f   :  { %v535_v5 = vmul.f32 %v1705_v62, %v534_v3  ;;  %v541_v7 = vmul.f32 %v1707_v4, %v529_v63  ;;  %vm547_vm1 = vweird.f32 %v1707_v4 }
 0x8a0   :  { %vm548_vm4 = vmor %vm546_vm2, %vm547_vm1 }
 0x8a1   :  { %v539_v9 = vsel %vm538_vm15, %v1705_v62, %v535_v5  ;;  %v542_v10 = vmul.f32 %v1707_v4, %v541_v7 }
 0x8a2   :  { %v550_v13 = vmul.f32 %v539_v9, %v516_v47 }
 0x8a3   :  { %v543_v15 = vmul.f32 0.5, %v542_v10 }
 0x8a4   :  { %v553_v16 = vmul.f32 %v552_v8, %v550_v13 }
 0x8a5   :  { %v544_v17 = vsub.f32 1.5, %v543_v15 }
 0x8a6   :  { %v2004_v18 = vadd.f32 %v555_v14, %v553_v16 }
 0x8a7   :  { %v545_v19 = vmul.f32 %v1707_v4, %v544_v17 }
 0x8a8   :  { %1604 = vmatmul.msk.f32.vlgmr.msra.gmra.mxu1 %vm93_vm3, %v2004_v18 }
 0x8a9   :  { %v549_v21 = vsel %vm548_vm4, %v1707_v4, %v545_v19 }
 0x8aa   :  { %v551_v22 = vmul.f32 %v549_v21, %v517_v51  ;;  %v671_v51 = vld [vmem:[%s2334_s7 + $0x8] sm:$0xff] }
 0x8ab   :  { %699 = vmatpush.msrb.mxu1 %v671_v51 }
 0x8ac   :  { %v554_v23 = vmul.f32 %v552_v8, %v551_v22 }
 0x8ad   :  { %700 = vmatpush.msrb.mxu1 %v670_v52 }
 0x8ae   :  { %v2008_v24 = vadd.f32 %v555_v14, %v554_v23 }
 0x8b0   :  { %1605 = vmatmul.msk.f32.gmra.mxu1 %vm93_vm3, %v2008_v24 }
 0x925   :  { %v586_v27 = vpop.f32.mrf.mxu1 }
 0x926   :  { %v2013_v28 = vadd.f32 %v586_v27, %v562_v26 }
 0x928   :  { %v2016_v29 = vmul.f32 0.70710677, %v2013_v28 }
 0x92a   :  { %v600_v30 = vand.u32 2147483647, %v2016_v29  ;;  %vm596_vm15 = vcmp.ge.f32.partialorder %v2016_v29, 0.0 }
 0x92b   :  { %v598_v40 = vsel %vm596_vm15, 1.0, %v1776_v38 }
 0x92c   :  { %v602_v31 = vmul.f32 0.3275911, %v600_v30  ;;  %v652_v57 = vsub.f32 0.0, %v600_v30 }
 0x92d   :  { %v589_v33 = vpop.f32.mrf.mxu1 }
 0x92e   :  { %v604_v34 = vadd.f32 1.0, %v602_v31  ;;  %v2019_v35 = vadd.f32 %v589_v33, %v562_v26  ;;  %v654_v63 = vmul.f32 %v652_v57, %v600_v30 }
 0x930   :  { %1708 = vrcp.f32 %v604_v34  ;;  %v2025_v37 = vmul.f32 0.70710677, %v2019_v35  ;;  %v617_v49 = vand.u32 2147483648, %v604_v34  ;;  %v615_v6 = vand.u32 2147483647, %v604_v34 }
 0x931   :  { %vm611_vm6 = vweird.f32 %v604_v34  ;;  %v656_v7 = vmul.f32 1.442695, %v654_v63 }
 0x932   :  { %v601_v39 = vand.u32 2147483647, %v2025_v37  ;;  %v618_v11 = vor.u32 1.1754944e-38, %v617_v49  ;;  %vm616_vm8 = vcmp.eq.f32.partialorder %v615_v6, 8.507059e+37  ;;  %vm597_vm1 = vcmp.ge.f32.partialorder %v2025_v37, 0.0 }
 0x933   :  { %v599_v49 = vsel %vm597_vm1, 1.0, %v1776_v38  ;;  %v593_v6 = vmul.f32 0.5, %v2019_v35 }
 0x934   :  { %v603_v41 = vmul.f32 0.3275911, %v601_v39  ;;  %v653_v10 = vsub.f32 0.0, %v601_v39 }
 0x936   :  { %v1709_v43 = vpop.eup %1708  ;;  %v605_v45 = vadd.f32 1.0, %v603_v41  ;;  %v655_v19 = vmul.f32 %v653_v10, %v601_v39  ;;  %v592_v39 = vmul.f32 0.5, %v2013_v28  ;;  %v678_v28 = vperm.slane %v1912_v12, 5 }
 0x937   :  { %v607_v44 = vmul.f32 %v1709_v43, %v604_v34  ;;  %vm612_vm5 = vweird.f32 %v1709_v43 }
 0x938   :  { %1710 = vrcp.f32 %v605_v45  ;;  %vm613_vm7 = vmor %vm611_vm6, %vm612_vm5  ;;  %v631_v62 = vand.u32 2147483648, %v605_v45  ;;  %v629_v1 = vand.u32 2147483647, %v605_v45  ;;  %vm625_vm10 = vweird.f32 %v605_v45 }
 0x939   :  { %v608_v47 = vsub.f32 1.0, %v607_v44  ;;  %1712 = vpow2.f32 %v656_v7  ;;  %v658_v27 = vmul.f32 1.442695, %v655_v19 }
 0x93a   :  { %v632_v5 = vor.u32 1.1754944e-38, %v631_v62  ;;  %vm630_vm14 = vcmp.eq.f32.partialorder %v629_v1, 8.507059e+37 }
 0x93b   :  { %v609_v50 = vmul.f32 %v1709_v43, %v608_v47  ;;  %1714 = vpow2.f32 %v658_v27 }
 0x93d   :  { %v610_v53 = vadd.f32 %v1709_v43, %v609_v50 }
 0x93e   :  { %v1711_v54 = vpop.eup %1710 }
 0x93f   :  { %v614_v55 = vsel %vm613_vm7, %v1709_v43, %v610_v53  ;;  %v621_v58 = vmul.f32 %v1711_v54, %v605_v45  ;;  %vm626_vm9 = vweird.f32 %v1711_v54  ;;  %v1713_v30 = vpop.eup %1712 }
 0x940   :  { %v619_v56 = vsel %vm616_vm8, %v618_v11, %v614_v55  ;;  %vm627_vm13 = vmor %vm625_vm10, %vm626_vm9 }
 0x941   :  { %v634_v59 = vmul.f32 1.0614054, %v619_v56  ;;  %v622_v60 = vsub.f32 1.0, %v621_v58  ;;  %v1715_v46 = vpop.eup %1714 }
 0x943   :  { %v636_v61 = vadd.f32 -1.4531521, %v634_v59  ;;  %v623_v0 = vmul.f32 %v1711_v54, %v622_v60 }
 0x945   :  { %v638_v2 = vmul.f32 %v636_v61, %v619_v56  ;;  %v624_v3 = vadd.f32 %v1711_v54, %v623_v0 }
 0x947   :  { %v640_v4 = vadd.f32 1.4214138, %v638_v2  ;;  %v628_v8 = vsel %vm627_vm13, %v1711_v54, %v624_v3  ;;  %v1611_v3 = vld [vmem:[%s2328_s4 + $0x30] sm:$0xff] }
 0x948   :  { %v633_v13 = vsel %vm630_vm14, %v632_v5, %v628_v8  ;;  %v1609_v5 = vld [vmem:[%s2328_s4 + $0x20] sm:$0xff] }
 0x949   :  { %v642_v9 = vmul.f32 %v640_v4, %v619_v56  ;;  %v635_v14 = vmul.f32 1.0614054, %v633_v13  ;;  %v1610_v4 = vld [vmem:[%s2328_s4 + $0x28] sm:$0xff] }
 0x94b   :  { %v644_v15 = vadd.f32 -0.28449672, %v642_v9  ;;  %v637_v16 = vadd.f32 -1.4531521, %v635_v14 }
 0x94d   :  { %v646_v17 = vmul.f32 %v644_v15, %v619_v56  ;;  %v639_v21 = vmul.f32 %v637_v16, %v633_v13 }
 0x94f   :  { %v648_v22 = vadd.f32 0.2548296, %v646_v17  ;;  %v641_v23 = vadd.f32 1.4214138, %v639_v21 }
 0x951   :  { %v650_v26 = vmul.f32 %v648_v22, %v619_v56  ;;  %v643_v31 = vmul.f32 %v641_v23, %v633_v13 }
 0x953   :  { %v660_v33 = vmul.f32 %v1713_v30, %v650_v26  ;;  %v645_v34 = vadd.f32 -0.28449672, %v643_v31  ;;  %v754_v26 = vperm.slane %v1912_v12, 6 }
 0x955   :  { %v662_v36 = vsub.f32 1.0, %v660_v33  ;;  %v647_v41 = vmul.f32 %v645_v34, %v633_v13  ;;  %v757_v34 = vperm.slane %v1912_v12, 7  ;;  %v2093_v12 = vld [vmem:[%s2330_s8 + $0x8] sm:$0xff] }
 0x957   :  { %v664_v42 = vmul.f32 %v662_v36, %v598_v40  ;;  %v649_v43 = vadd.f32 0.2548296, %v647_v41 }
 0x959   :  { %v666_v44 = vadd.f32 1.0, %v664_v42  ;;  %v651_v45 = vmul.f32 %v649_v43, %v633_v13 }
 0x95b   :  { %v668_v47 = vmul.f32 %v666_v44, %v592_v39  ;;  %v661_v48 = vmul.f32 %v1715_v46, %v651_v45 }
 0x95d   :  { %1606 = vmatmul.msk.f32.vlgmr.msrb.gmra.mxu1 %vm63_vm0, %v668_v47  ;;  %v663_v29 = vsub.f32 1.0, %v661_v48  ;;  %v767_v47 = vperm.slane %v2093_v12, 0 }
 0x95f   :  { %v665_v50 = vmul.f32 %v663_v29, %v599_v49 }
 0x961   :  { %v667_v51 = vadd.f32 1.0, %v665_v50 }
 0x963   :  { %v669_v52 = vmul.f32 %v667_v51, %v593_v6 }
 0x965   :  { %1607 = vmatmul.msk.f32.gmra.mxu1 %vm63_vm0, %v669_v52 }
 0x9da   :  { %v702_v53 = vpop.f32.mrf.mxu1 }
 0x9db   :  { %v703_v11 = vadd.f32 %v702_v53, %v678_v28 }
 0x9dd   :  { %v708_v54 = vadd.f32 %v703_v11, %v2004_v18 }
 0x9df   :  { %v710_v37 = vsel %vm93_vm3, %v708_v54, 0.0 }
 0x9e0   :  { %711 = vadd.xlane.f32.xlu1 %v710_v37 }
 0x9e2   :  { %v705_v55 = vpop.f32.mrf.mxu1 }
 0x9e3   :  { %v706_v56 = vadd.f32 %v705_v55, %v678_v28 }
 0x9e5   :  { %v709_v57 = vadd.f32 %v706_v56, %v2008_v24  ;;  %v1612_v24 = vld [vmem:[%s2328_s4 + $0x38] sm:$0xff] }
 0x9e6   :  { %786 = vmatpush.msrb.mxu2 %v1612_v24 }
 0x9e7   :  { %v713_v58 = vsel %vm93_vm3, %v709_v57, 0.0 }
 0x9e8   :  { %714 = vadd.xlane.f32.xlu2 %v713_v58  ;;  %787 = vmatpush.msrb.mxu2 %v1611_v3 }
 0x9ea   :  { %788 = vmatpush.msrb.mxu2 %v1610_v4 }
 0x9ec   :  { %789 = vmatpush.msrb.mxu2 %v1609_v5 }
 0xa53   :  { %v712_v35 = vpop.xlane.xlu1 %711 }
 0xa54   :  { %v716_v59 = vmul.f32 %v712_v35, %v1878_v32 }
 0xa56   :  { %v718_v60 = vsub.f32 %v708_v54, %v716_v59 }
 0xa58   :  { %v720_v61 = vmul.f32 %v718_v60, %v718_v60 }
 0xa5a   :  { %v722_v62 = vsel %vm93_vm3, %v720_v61, 0.0 }
 0xa5b   :  { %723 = vadd.xlane.f32.xlu2 %v722_v62  ;;  %v715_v63 = vpop.xlane.xlu2 %714 }
 0xa5c   :  { %v717_v18 = vmul.f32 %v715_v63, %v1878_v32 }
 0xa5e   :  { %v719_v0 = vsub.f32 %v709_v57, %v717_v18 }
 0xa60   :  { %v721_v1 = vmul.f32 %v719_v0, %v719_v0 }
 0xa62   :  { %v725_v2 = vsel %vm93_vm3, %v721_v1, 0.0 }
 0xa63   :  { %726 = vadd.xlane.f32.xlu0 %v725_v2 }
 0xace   :  { %v724_v7 = vpop.xlane.xlu2 %723 }
 0xacf   :  { %v728_v8 = vmul.f32 %v724_v7, %v1878_v32 }
 0xad1   :  { %v730_v9 = vadd.f32 1e-12, %v728_v8 }
 0xad3   :  { %1716 = vrsqrt.f32 %v730_v9  ;;  %vm738_vm4 = vweird.f32 %v730_v9 }
 0xad6   :  { %v727_v10 = vpop.xlane.xlu0 %726 }
 0xad7   :  { %v729_v13 = vmul.f32 %v727_v10, %v1878_v32 }
 0xad9   :  { %v1717_v14 = vpop.eup %1716  ;;  %v731_v16 = vadd.f32 1e-12, %v729_v13 }
 0xada   :  { %v733_v15 = vmul.f32 %v1717_v14, %v730_v9  ;;  %vm739_vm2 = vweird.f32 %v1717_v14 }
 0xadb   :  { %1718 = vrsqrt.f32 %v731_v16  ;;  %vm740_vm5 = vmor %vm738_vm4, %vm739_vm2  ;;  %vm748_vm7 = vweird.f32 %v731_v16 }
 0xadc   :  { %v734_v17 = vmul.f32 %v1717_v14, %v733_v15 }
 0xade   :  { %v735_v19 = vmul.f32 0.5, %v734_v17 }
 0xae0   :  { %v736_v21 = vsub.f32 1.5, %v735_v19 }
 0xae1   :  { %v1719_v22 = vpop.eup %1718 }
 0xae2   :  { %v737_v23 = vmul.f32 %v1717_v14, %v736_v21  ;;  %v743_v27 = vmul.f32 %v1719_v22, %v731_v16  ;;  %vm749_vm6 = vweird.f32 %v1719_v22 }
 0xae3   :  { %vm750_vm8 = vmor %vm748_vm7, %vm749_vm6 }
 0xae4   :  { %v741_v30 = vsel %vm740_vm5, %v1717_v14, %v737_v23  ;;  %v744_v33 = vmul.f32 %v1719_v22, %v743_v27 }
 0xae5   :  { %v752_v31 = vmul.f32 %v741_v30, %v718_v60 }
 0xae6   :  { %v745_v40 = vmul.f32 0.5, %v744_v33 }
 0xae7   :  { %v755_v36 = vmul.f32 %v754_v26, %v752_v31 }
 0xae8   :  { %v746_v41 = vsub.f32 1.5, %v745_v40 }
 0xae9   :  { %v2082_v42 = vadd.f32 %v757_v34, %v755_v36 }
 0xaea   :  { %v747_v43 = vmul.f32 %v1719_v22, %v746_v41 }
 0xaeb   :  { %1613 = vmatmul.msk.f32.vlgmr.msrb.gmra.mxu2 %vm93_vm3, %v2082_v42 }
 0xaec   :  { %v751_v39 = vsel %vm750_vm8, %v1719_v22, %v747_v43 }
 0xaed   :  { %v753_v44 = vmul.f32 %v751_v39, %v719_v0 }
 0xaef   :  { %v756_v45 = vmul.f32 %v754_v26, %v753_v44 }
 0xaf1   :  { %v2086_v46 = vadd.f32 %v757_v34, %v756_v45 }
 0xaf3   :  { %1614 = vmatmul.msk.f32.gmra.mxu2 %vm93_vm3, %v2086_v46 }
 0xb6e   :  { %v791_v48 = vpop.f32.mrf.mxu2 }
 0xb6f   :  { %v2096_v29 = vadd.f32 %v791_v48, %v767_v47 }
 0xb71   :  { %931 = vrot.lane.b32.xlu1 %v2096_v29, %s1771_s13  ;;  %798 = vrot.lane.b32.xlu2 %v2096_v29, %s1770_s12 }
 0xb76   :  { %v794_v49 = vpop.f32.mrf.mxu2 }
 0xb77   :  { %v2102_v50 = vadd.f32 %v794_v49, %v767_v47 }
 0xb79   :  { %929 = vrot.lane.b32.xlu2 %v2096_v29, %s1772_s14  ;;  %825 = vrot.lane.b32.xlu0 %v2102_v50, %s1770_s12  ;;  %v1675_v13 = vpack.i.bf16 %v2102_v50, %v2096_v29 }
 0xb81   :  { %957 = vrot.lane.b32.xlu2 %v2102_v50, %s1772_s14  ;;  %959 = vrot.lane.b32.xlu0 %v2102_v50, %s1771_s13 }
 0xbcb   :  { %v799_v6 = vpop.permute.xlu2 %798 }
 0xbcc   :  { %1615 = vmatpush.xpose.msk.msra.mxu3 %vm191_vm11, %v799_v6 }
 0xbcf   :  { %1616 = vmatmul.msk.f32.vlgmr.msra.gmra.mxu3 %vm191_vm11, %v2096_v29 }
 0xbd3   :  { %v930_v52 = vpop.permute.xlu2 %929 }
 0xbdb   :  { %v958_v11 = vpop.permute.xlu2 %957 }
 0xbe3   :  { %v932_v28 = vpop.permute.xlu1 %931 }
 0xbeb   :  { %v826_v51 = vpop.permute.xlu0 %825 }
 0xbec   :  { %1617 = vmatpush.xpose.msk.msra.mxu0 %vm191_vm11, %v826_v51  ;;  %v1630_v51 = vld [vmem:[%s2332_s5 + $0x38] sm:$0xff] }
 0xbef   :  { %1618 = vmatmul.msk.f32.vlgmr.msra.gmra.mxu0 %vm191_vm11, %v2102_v50 }
 0xbf0   :  { %1621 = vmatpush.xpose.msk.msrb.mxu0 %vm191_vm11, %v932_v28  ;;  %v1628_v28 = vld [vmem:[%s2332_s5 + $0x28] sm:$0xff] }
 0xbf3   :  { %v960_v53 = vpop.permute.xlu0 %959 }
 0xbf4   :  { %1623 = vmatpush.xpose.msk.msra.mxu1 %vm191_vm11, %v960_v53  ;;  %1097 = vmatpush.msra.mxu0 %v1630_v51 }
 0xbf7   :  { %1622 = vmatmul.msk.f32.vlgmr.msrb.gmra.mxu0 %vm191_vm11, %v930_v52  ;;  %1624 = vmatmul.msk.f32.vlgmr.msra.gmra.mxu1 %vm191_vm11, %v958_v11  ;;  %v1629_v52 = vld [vmem:[%s2332_s5 + $0x30] sm:$0xff] }
 0xbf8   :  { %1098 = vmatpush.msra.mxu0 %v1629_v52 }
 0xbfa   :  { %1099 = vmatpush.msra.mxu0 %v1628_v28  ;;  %v1165_v28 = vperm.slane %v2093_v12, 4 }
 0xc52   :  { %v821_v54 = vpop.f32.mrf.mxu3 }
 0xc53   :  { %v851_v37 = vmul.f32 0.25, %v821_v54 }
 0xc55   :  { %v853_v55 = vadd.f32 %v1927_v20, %v851_v37 }
 0xc57   :  { %v855_v56 = vsel %vm253_vm12, %v853_v55, -inf }
 0xc58   :  { %856 = vmax.xlane.f32.xlu0 %v855_v56 }
 0xc6c   :  { %v848_v57 = vpop.f32.mrf.mxu0 }
 0xc6d   :  { %v852_v58 = vmul.f32 0.25, %v848_v57 }
 0xc6f   :  { %v854_v35 = vadd.f32 %v1934_v25, %v852_v58 }
 0xc71   :  { %v858_v59 = vsel %vm253_vm12, %v854_v35, -inf }
 0xc72   :  { %859 = vmax.xlane.f32.xlu2 %v858_v59  ;;  %v1078_v59 = vperm.slane %v2093_v12, 1 }
 0xc74   :  { %v954_v60 = vpop.f32.mrf.mxu0  ;;  %v982_v61 = vpop.f32.mrf.mxu1 }
 0xc75   :  { %v985_v62 = vmul.f32 0.25, %v954_v60  ;;  %v986_v63 = vmul.f32 0.25, %v982_v61 }
 0xc77   :  { %v987_v18 = vadd.f32 %v1927_v20, %v985_v62  ;;  %v988_v0 = vadd.f32 %v1934_v25, %v986_v63 }
 0xc79   :  { %v989_v1 = vsel %vm253_vm12, %v987_v18, -inf  ;;  %v992_v2 = vsel %vm253_vm12, %v988_v0, -inf }
 0xc7a   :  { %990 = vmax.xlane.f32.xlu1 %v989_v1  ;;  %993 = vmax.xlane.f32.xlu0 %v992_v2 }
 0xccb   :  { %v857_v24 = vpop.xlane.xlu0 %856 }
 0xccc   :  { %v861_v3 = vsub.f32 %v853_v55, %v857_v24  ;;  %v1627_v55 = vld [vmem:[%s2332_s5 + $0x20] sm:$0xff] }
 0xccd   :  { %1100 = vmatpush.msra.mxu0 %v1627_v55 }
 0xcce   :  { %v863_v4 = vmul.f32 1.442695, %v861_v3 }
 0xcd0   :  { %1720 = vpow2.f32 %v863_v4 }
 0xcd6   :  { %v1721_v5 = vpop.eup %1720 }
 0xcd7   :  { %v867_v7 = vsel %vm253_vm12, %v1721_v5, 0.0 }
 0xcd8   :  { %868 = vadd.xlane.f32.xlu2 %v867_v7 }
 0xce5   :  { %v860_v8 = vpop.xlane.xlu2 %859 }
 0xce6   :  { %v862_v9 = vsub.f32 %v854_v35, %v860_v8 }
 0xce8   :  { %v865_v10 = vmul.f32 1.442695, %v862_v9 }
 0xcea   :  { %1722 = vpow2.f32 %v865_v10 }
 0xced   :  { %v991_v20 = vpop.xlane.xlu1 %990  ;;  %v994_v25 = vpop.xlane.xlu0 %993 }
 0xcee   :  { %v995_v14 = vsub.f32 %v987_v18, %v991_v20  ;;  %v996_v15 = vsub.f32 %v988_v0, %v994_v25  ;;  %v1635_v25 = vld [vmem:[%s2333_s6 + $0x30] sm:$0xff] }
 0xcf0   :  { %1676 = vrot.lane.b32.xlu2 %v1675_v13, %s1773_s18  ;;  %v1723_v16 = vpop.eup %1722  ;;  %v997_v17 = vmul.f32 1.442695, %v995_v14  ;;  %v999_v19 = vmul.f32 1.442695, %v996_v15  ;;  %v1634_v13 = vld [vmem:[%s2333_s6 + $0x28] sm:$0xff]  ;;  %v1633_v14 = vld [vmem:[%s2333_s6 + $0x20] sm:$0xff] }
 0xcf1   :  { %v870_v21 = vsel %vm253_vm12, %v1723_v16, 0.0 }
 0xcf2   :  { %1724 = vpow2.f32 %v997_v17  ;;  %871 = vadd.xlane.f32.xlu0 %v870_v21 }
 0xcf3   :  { %1726 = vpow2.f32 %v999_v19 }
 0xcf8   :  { %v1725_v22 = vpop.eup %1724 }
 0xcf9   :  { %v1727_v23 = vpop.eup %1726  ;;  %v1001_v26 = vsel %vm253_vm12, %v1725_v22, 0.0 }
 0xcfa   :  { %1002 = vadd.xlane.f32.xlu1 %v1001_v26  ;;  %v1004_v27 = vsel %vm253_vm12, %v1727_v23, 0.0 }
 0xcfb   :  { %1005 = vadd.xlane.f32.xlu0 %v1004_v27 }
 0xd0f   :  { %1037 = vrot.lane.b32.xlu0 %v2102_v50, %s1774_s1 }
 0xd13   :  { %1011 = vrot.lane.b32.xlu1 %v2096_v29, %s1774_s1 }
 0xd4b   :  { %v869_v30 = vpop.xlane.xlu2 %868 }
 0xd4c   :  { %1728 = vrcp.f32 %v869_v30 }
 0xd52   :  { %v1729_v31 = vpop.eup %1728 }
 0xd53   :  { %v1677_v33 = vpop.permute.xlu2 %1676  ;;  %v875_v40 = vmul.f32 %v1729_v31, %v1721_v5  ;;  %v1154_v31 = vperm.slane %v2093_v12, 2 }
 0xd54   :  { %v1679_v34 = vunpack.i.h.bf16 %v1677_v33  ;;  %v1678_v36 = vunpack.i.l.bf16 %v1677_v33 }
 0xd56   :  { %898 = vmatpush.msra.mxu2 %v1678_v36  ;;  %924 = vmatpush.msrb.mxu3 %v1679_v34 }
 0xd57   :  { %1619 = vmatmul.msk.f32.vlgmr.msra.gmra.mxu2 %vm253_vm12, %v875_v40 }
 0xd65   :  { %v872_v41 = vpop.xlane.xlu0 %871 }
 0xd66   :  { %1730 = vrcp.f32 %v872_v41  ;;  %v1157_v41 = vperm.slane %v2093_v12, 3 }
 0xd6c   :  { %v1731_v43 = vpop.eup %1730 }
 0xd6d   :  { %v876_v39 = vmul.f32 %v1731_v43, %v1723_v16  ;;  %v1003_v45 = vpop.xlane.xlu1 %1002 }
 0xd6e   :  { %v1006_v44 = vpop.xlane.xlu0 %1005 }
 0xd6f   :  { %1620 = vmatmul.msk.f32.vlgmr.msrb.gmra.mxu3 %vm253_vm12, %v876_v39  ;;  %1732 = vrcp.f32 %v1006_v44 }
 0xd70   :  { %1734 = vrcp.f32 %v1003_v45 }
 0xd75   :  { %v1733_v47 = vpop.eup %1732 }
 0xd76   :  { %v1010_v48 = vmul.f32 %v1733_v47, %v1727_v23  ;;  %v1735_v49 = vpop.eup %1734 }
 0xd77   :  { %v1009_v50 = vmul.f32 %v1735_v49, %v1725_v22 }
 0xd81   :  { %v1038_v29 = vpop.permute.xlu0 %1037 }
 0xd82   :  { %1058 = vmatpush.msra.mxu3 %v1038_v29 }
 0xd83   :  { %1626 = vmatmul.msk.f32.vlgmr.msra.gmra.mxu3 %vm253_vm12, %v1010_v48 }
 0xd85   :  { %v1012_v6 = vpop.permute.xlu1 %1011 }
 0xd86   :  { %1032 = vmatpush.msrb.mxu2 %v1012_v6 }
 0xd87   :  { %1625 = vmatmul.msk.f32.vlgmr.msrb.gmra.mxu2 %vm253_vm12, %v1009_v50 }
 0xdda   :  { %v900_v11 = vpop.f32.mrf.mxu2 }
 0xdf2   :  { %v926_v53 = vpop.f32.mrf.mxu3 }
 0xe06   :  { %v1060_v54 = vpop.f32.mrf.mxu3 }
 0xe07   :  { %1067 = vrot.lane.b32.xlu0 %v1060_v54, %s1775_s23 }
 0xe0a   :  { %v1034_v37 = vpop.f32.mrf.mxu2 }
 0xe0b   :  { %1065 = vrot.lane.b32.xlu2 %v1034_v37, %s1775_s23 }
 0xe65   :  { %v1066_v56 = vpop.permute.xlu2 %1065 }
 0xe66   :  { %v1071_v57 = vsel %vm191_vm11, %v900_v11, %v1066_v56 }
 0xe67   :  { %1631 = vmatmul.msk.f32.vlgmr.msra.gmra.mxu0 %vm93_vm3, %v1071_v57  ;;  %v1646_v57 = vld [vmem:[%s2334_s7 + $0x78] sm:$0xff] }
 0xe68   :  { %1297 = vmatpush.msra.mxu2 %v1646_v57 }
 0xe79   :  { %v1068_v58 = vpop.permute.xlu0 %1067 }
 0xe7a   :  { %v1072_v35 = vsel %vm191_vm11, %v926_v53, %v1068_v58  ;;  %v1645_v58 = vld [vmem:[%s2334_s7 + $0x70] sm:$0xff] }
 0xe7b   :  { %1632 = vmatmul.msk.f32.gmra.mxu0 %vm93_vm3, %v1072_v35  ;;  %1298 = vmatpush.msra.mxu2 %v1645_v58  ;;  %v1644_v35 = vld [vmem:[%s2334_s7 + $0x68] sm:$0xff] }
 0xe7d   :  { %1299 = vmatpush.msra.mxu2 %v1644_v35 }
 0xee4   :  { %v1102_v60 = vpop.f32.mrf.mxu0 }
 0xee5   :  { %v1103_v61 = vadd.f32 %v1102_v60, %v1078_v59 }
 0xee7   :  { %v1108_v62 = vadd.f32 %v1103_v61, %v2082_v42  ;;  %v1642_v61 = vld [vmem:[%s2334_s7 + $0x58] sm:$0xff] }
 0xee9   :  { %v1110_v63 = vsel %vm93_vm3, %v1108_v62, 0.0 }
 0xeea   :  { %1111 = vadd.xlane.f32.xlu1 %v1110_v63  ;;  %v1641_v63 = vld [vmem:[%s2334_s7 + $0x50] sm:$0xff] }
 0xef8   :  { %v1105_v18 = vpop.f32.mrf.mxu0 }
 0xef9   :  { %v1106_v0 = vadd.f32 %v1105_v18, %v1078_v59  ;;  %v1643_v59 = vld [vmem:[%s2334_s7 + $0x60] sm:$0xff] }
 0xefa   :  { %1300 = vmatpush.msra.mxu2 %v1643_v59 }
 0xefb   :  { %v1109_v1 = vadd.f32 %v1106_v0, %v2086_v46  ;;  %v1636_v46 = vld [vmem:[%s2333_s6 + $0x38] sm:$0xff] }
 0xefc   :  { %1184 = vmatpush.msrb.mxu1 %v1636_v46  ;;  %1301 = vmatpush.msra.mxu2 %v1642_v61 }
 0xefd   :  { %v1113_v2 = vsel %vm93_vm3, %v1109_v1, 0.0 }
 0xefe   :  { %1114 = vadd.xlane.f32.xlu2 %v1113_v2  ;;  %1185 = vmatpush.msrb.mxu1 %v1635_v25 }
 0xeff   :  { %1302 = vmatpush.msra.mxu2 %v1641_v63 }
 0xf00   :  { %1186 = vmatpush.msrb.mxu1 %v1634_v13 }
 0xf02   :  { %1187 = vmatpush.msrb.mxu1 %v1633_v14 }
 0xf5d   :  { %v1112_v24 = vpop.xlane.xlu1 %1111 }
 0xf5e   :  { %v1116_v3 = vmul.f32 %v1112_v24, %v1878_v32  ;;  %v1640_v24 = vld [vmem:[%s2334_s7 + $0x48] sm:$0xff] }
 0xf5f   :  { %1303 = vmatpush.msra.mxu2 %v1640_v24 }
 0xf60   :  { %v1118_v4 = vsub.f32 %v1108_v62, %v1116_v3 }
 0xf62   :  { %v1120_v5 = vmul.f32 %v1118_v4, %v1118_v4 }
 0xf64   :  { %v1122_v7 = vsel %vm93_vm3, %v1120_v5, 0.0  ;;  %v1639_v5 = vld [vmem:[%s2334_s7 + $0x40] sm:$0xff] }
 0xf65   :  { %1123 = vadd.xlane.f32.xlu0 %v1122_v7  ;;  %1304 = vmatpush.msra.mxu2 %v1639_v5 }
 0xf71   :  { %v1115_v8 = vpop.xlane.xlu2 %1114 }
 0xf72   :  { %v1117_v42 = vmul.f32 %v1115_v8, %v1878_v32 }
 0xf74   :  { %v1119_v9 = vsub.f32 %v1109_v1, %v1117_v42 }
 0xf76   :  { %v1121_v10 = vmul.f32 %v1119_v9, %v1119_v9 }
 0xf78   :  { %v1125_v20 = vsel %vm93_vm3, %v1121_v10, 0.0 }
 0xf79   :  { %1126 = vadd.xlane.f32.xlu2 %v1125_v20 }
 0xfd8   :  { %v1124_v15 = vpop.xlane.xlu0 %1123 }
 0xfd9   :  { %v1128_v16 = vmul.f32 %v1124_v15, %v1878_v32 }
 0xfdb   :  { %v1130_v17 = vadd.f32 1e-12, %v1128_v16 }
 0xfdd   :  { %1736 = vrsqrt.f32 %v1130_v17  ;;  %vm1138_vm9 = vweird.f32 %v1130_v17 }
 0xfe3   :  { %v1737_v19 = vpop.eup %1736 }
 0xfe4   :  { %v1133_v21 = vmul.f32 %v1737_v19, %v1130_v17  ;;  %vm1139_vm12 = vweird.f32 %v1737_v19 }
 0xfe5   :  { %vm1140_vm10 = vmor %vm1138_vm9, %vm1139_vm12 }
 0xfe6   :  { %v1134_v22 = vmul.f32 %v1737_v19, %v1133_v21 }
 0xfe8   :  { %v1135_v23 = vmul.f32 0.5, %v1134_v22 }
 0xfea   :  { %v1136_v26 = vsub.f32 1.5, %v1135_v23 }
 0xfec   :  { %v1137_v27 = vmul.f32 %v1737_v19, %v1136_v26  ;;  %v1127_v30 = vpop.xlane.xlu2 %1126 }
 0xfed   :  { %v1129_v33 = vmul.f32 %v1127_v30, %v1878_v32 }
 0xfee   :  { %v1141_v34 = vsel %vm1140_vm10, %v1737_v19, %v1137_v27 }
 0xfef   :  { %v1152_v36 = vmul.f32 %v1141_v34, %v1118_v4  ;;  %v1131_v40 = vadd.f32 1e-12, %v1129_v33 }
 0xff1   :  { %v1155_v43 = vmul.f32 %v1154_v31, %v1152_v36  ;;  %1738 = vrsqrt.f32 %v1131_v40  ;;  %vm1148_vm14 = vweird.f32 %v1131_v40 }
 0xff3   :  { %v2188_v39 = vadd.f32 %v1157_v41, %v1155_v43 }
 0xff5   :  { %1637 = vmatmul.msk.f32.vlgmr.msrb.gmra.mxu1 %vm93_vm3, %v2188_v39 }
 0xff7   :  { %v1739_v44 = vpop.eup %1738 }
 0xff8   :  { %v1143_v45 = vmul.f32 %v1739_v44, %v1131_v40  ;;  %vm1149_vm13 = vweird.f32 %v1739_v44 }
 0xff9   :  { %vm1150_vm15 = vmor %vm1148_vm14, %vm1149_vm13 }
 0xffa   :  { %v1144_v47 = vmul.f32 %v1739_v44, %v1143_v45 }
 0xffc   :  { %v1145_v48 = vmul.f32 0.5, %v1144_v47 }
 0xffe   :  { %v1146_v29 = vsub.f32 1.5, %v1145_v48 }
0x1000   :  { %v1147_v49 = vmul.f32 %v1739_v44, %v1146_v29 }
0x1002   :  { %v1151_v50 = vsel %vm1150_vm15, %v1739_v44, %v1147_v49 }
0x1003   :  { %v1153_v6 = vmul.f32 %v1151_v50, %v1119_v9 }
0x1005   :  { %v1156_v51 = vmul.f32 %v1154_v31, %v1153_v6 }
0x1007   :  { %v2192_v52 = vadd.f32 %v1157_v41, %v1156_v51 }
0x1009   :  { %1638 = vmatmul.msk.f32.gmra.mxu1 %vm93_vm3, %v2192_v52 }
0x1072   :  { %v1189_v53 = vpop.f32.mrf.mxu1 }
0x1073   :  { %v2197_v11 = vadd.f32 %v1189_v53, %v1165_v28 }
0x1075   :  { %v2200_v54 = vmul.f32 0.70710677, %v2197_v11 }
0x1077   :  { %v1203_v37 = vand.u32 2147483647, %v2200_v54  ;;  %vm1199_vm12 = vcmp.ge.f32.partialorder %v2200_v54, 0.0 }
0x1078   :  { %v1201_v51 = vsel %vm1199_vm12, 1.0, %v1776_v38 }
0x1079   :  { %v1205_v55 = vmul.f32 0.3275911, %v1203_v37  ;;  %v1255_v46 = vsub.f32 0.0, %v1203_v37 }
0x107b   :  { %v1207_v56 = vadd.f32 1.0, %v1205_v55  ;;  %v1257_v16 = vmul.f32 %v1255_v46, %v1203_v37  ;;  %v1195_v55 = vmul.f32 0.5, %v2197_v11 }
0x107d   :  { %1740 = vrcp.f32 %v1207_v56  ;;  %v1220_v1 = vand.u32 2147483648, %v1207_v56  ;;  %v1218_v4 = vand.u32 2147483647, %v1207_v56  ;;  %vm1214_vm2 = vweird.f32 %v1207_v56 }
0x107e   :  { %v1259_v21 = vmul.f32 1.442695, %v1257_v16 }
0x107f   :  { %v1221_v42 = vor.u32 1.1754944e-38, %v1220_v1  ;;  %vm1219_vm5 = vcmp.eq.f32.partialorder %v1218_v4, 8.507059e+37 }
0x1083   :  { %v1741_v60 = vpop.eup %1740 }
0x1084   :  { %v1210_v62 = vmul.f32 %v1741_v60, %v1207_v56  ;;  %vm1215_vm1 = vweird.f32 %v1741_v60 }
0x1085   :  { %vm1216_vm4 = vmor %vm1214_vm2, %vm1215_vm1 }
0x1086   :  { %v1211_v18 = vsub.f32 1.0, %v1210_v62  ;;  %v1192_v0 = vpop.f32.mrf.mxu1 }
0x1087   :  { %v2221_v2 = vadd.f32 %v1192_v0, %v1165_v28 }
0x1088   :  { %v1212_v3 = vmul.f32 %v1741_v60, %v1211_v18 }
0x1089   :  { %v2230_v7 = vmul.f32 0.70710677, %v2221_v2 }
0x108a   :  { %v1213_v8 = vadd.f32 %v1741_v60, %v1212_v3  ;;  %v1196_v3 = vmul.f32 0.5, %v2221_v2 }
0x108b   :  { %v1204_v9 = vand.u32 2147483647, %v2230_v7  ;;  %vm1200_vm10 = vcmp.ge.f32.partialorder %v2230_v7, 0.0 }
0x108c   :  { %v1217_v10 = vsel %vm1216_vm4, %v1741_v60, %v1213_v8  ;;  %v1202_v11 = vsel %vm1200_vm10, 1.0, %v1776_v38  ;;  %v1282_v8 = vperm.slane %v2093_v12, 5 }
0x108d   :  { %v1222_v20 = vsel %vm1219_vm5, %v1221_v42, %v1217_v10  ;;  %v1206_v25 = vmul.f32 0.3275911, %v1204_v9  ;;  %v1256_v29 = vsub.f32 0.0, %v1204_v9 }
0x108e   :  { %v1237_v13 = vmul.f32 1.0614054, %v1222_v20 }
0x108f   :  { %v1208_v14 = vadd.f32 1.0, %v1206_v25  ;;  %v1258_v37 = vmul.f32 %v1256_v29, %v1204_v9 }
0x1090   :  { %v1239_v15 = vadd.f32 -1.4531521, %v1237_v13 }
0x1091   :  { %1742 = vrcp.f32 %v1208_v14  ;;  %v1234_v33 = vand.u32 2147483648, %v1208_v14  ;;  %v1232_v40 = vand.u32 2147483647, %v1208_v14  ;;  %vm1228_vm7 = vweird.f32 %v1208_v14 }
0x1092   :  { %v1241_v17 = vmul.f32 %v1239_v15, %v1222_v20  ;;  %1744 = vpow2.f32 %v1259_v21  ;;  %v1261_v59 = vmul.f32 1.442695, %v1258_v37 }
0x1093   :  { %v1235_v45 = vor.u32 1.1754944e-38, %v1234_v33  ;;  %vm1233_vm9 = vcmp.eq.f32.partialorder %v1232_v40, 8.507059e+37 }
0x1094   :  { %v1243_v19 = vadd.f32 1.4214138, %v1241_v17  ;;  %1746 = vpow2.f32 %v1261_v59  ;;  %v1365_v59 = vld [vmem:[%s2335_s9 + $0x8] sm:$0xff] }
0x1096   :  { %v1245_v22 = vmul.f32 %v1243_v19, %v1222_v20 }
0x1097   :  { %v1743_v23 = vpop.eup %1742 }
0x1098   :  { %v1247_v26 = vadd.f32 -0.28449672, %v1245_v22  ;;  %v1224_v27 = vmul.f32 %v1743_v23, %v1208_v14  ;;  %vm1229_vm6 = vweird.f32 %v1743_v23  ;;  %v1745_v44 = vpop.eup %1744 }
0x1099   :  { %vm1230_vm8 = vmor %vm1228_vm7, %vm1229_vm6 }
0x109a   :  { %v1249_v30 = vmul.f32 %v1247_v26, %v1222_v20  ;;  %v1225_v31 = vsub.f32 1.0, %v1224_v27  ;;  %v1747_v18 = vpop.eup %1746  ;;  %v1370_v26 = vld [vmem:[%s2335_s9 + $0x30] sm:$0xff]  ;;  %v1369_v27 = vld [vmem:[%s2335_s9 + $0x28] sm:$0xff] }
0x109c   :  { %v1251_v34 = vadd.f32 0.2548296, %v1249_v30  ;;  %v1226_v36 = vmul.f32 %v1743_v23, %v1225_v31  ;;  %v1368_v30 = vld [vmem:[%s2335_s9 + $0x20] sm:$0xff] }
0x109e   :  { %v1253_v41 = vmul.f32 %v1251_v34, %v1222_v20  ;;  %v1227_v43 = vadd.f32 %v1743_v23, %v1226_v36 }
0x10a0   :  { %v1263_v47 = vmul.f32 %v1745_v44, %v1253_v41  ;;  %v1231_v48 = vsel %vm1230_vm8, %v1743_v23, %v1227_v43 }
0x10a1   :  { %v1236_v49 = vsel %vm1233_vm9, %v1235_v45, %v1231_v48  ;;  %v1358_v48 = vperm.slane %v2093_v12, 6 }
0x10a2   :  { %v1265_v50 = vsub.f32 1.0, %v1263_v47  ;;  %v1238_v6 = vmul.f32 1.0614054, %v1236_v49 }
0x10a4   :  { %v1267_v28 = vmul.f32 %v1265_v50, %v1201_v51  ;;  %v1240_v53 = vadd.f32 -1.4531521, %v1238_v6  ;;  %v1361_v51 = vperm.slane %v2093_v12, 7  ;;  %v1366_v12 = vld [vmem:[%s2335_s9 + $0x10] sm:$0xff] }
0x10a6   :  { %v1269_v56 = vadd.f32 1.0, %v1267_v28  ;;  %v1242_v57 = vmul.f32 %v1240_v53, %v1236_v49 }
0x10a8   :  { %v1271_v58 = vmul.f32 %v1269_v56, %v1195_v55  ;;  %v1244_v35 = vadd.f32 1.4214138, %v1242_v57 }
0x10aa   :  { %1647 = vmatmul.msk.f32.vlgmr.msra.gmra.mxu2 %vm63_vm0, %v1271_v58  ;;  %v1246_v54 = vmul.f32 %v1244_v35, %v1236_v49 }
0x10ac   :  { %v1248_v60 = vadd.f32 -0.28449672, %v1246_v54 }
0x10ae   :  { %v1250_v61 = vmul.f32 %v1248_v60, %v1236_v49 }
0x10b0   :  { %v1252_v62 = vadd.f32 0.2548296, %v1250_v61  ;;  %v1364_v61 = vld [vmem:[%s2335_s9] sm:$0xff] }
0x10b2   :  { %v1254_v63 = vmul.f32 %v1252_v62, %v1236_v49 }
0x10b4   :  { %v1264_v0 = vmul.f32 %v1747_v18, %v1254_v63 }
0x10b6   :  { %v1266_v1 = vsub.f32 1.0, %v1264_v0 }
0x10b8   :  { %v1268_v24 = vmul.f32 %v1266_v1, %v1202_v11 }
0x10ba   :  { %v1270_v4 = vadd.f32 1.0, %v1268_v24 }
0x10bc   :  { %v1272_v5 = vmul.f32 %v1270_v4, %v1196_v3 }
0x10be   :  { %1648 = vmatmul.msk.f32.gmra.mxu2 %vm63_vm0, %v1272_v5 }
0x112d   :  { %v1306_v42 = vpop.f32.mrf.mxu2 }
0x112e   :  { %v1307_v9 = vadd.f32 %v1306_v42, %v1282_v8 }
0x1130   :  { %v1312_v10 = vadd.f32 %v1307_v9, %v2188_v39 }
0x1132   :  { %v1314_v20 = vsel %vm93_vm3, %v1312_v10, 0.0 }
0x1133   :  { %1315 = vadd.xlane.f32.xlu1 %v1314_v20 }
0x1141   :  { %v1309_v7 = vpop.f32.mrf.mxu2 }
0x1142   :  { %v1310_v46 = vadd.f32 %v1309_v7, %v1282_v8 }
0x1144   :  { %v1313_v25 = vadd.f32 %v1310_v46, %v2192_v52  ;;  %v1371_v52 = vld [vmem:[%s2335_s9 + $0x38] sm:$0xff] }
0x1145   :  { %1499 = vmatpush.msrb.mxu0 %v1371_v52 }
0x1146   :  { %v1317_v13 = vsel %vm93_vm3, %v1313_v25, 0.0 }
0x1147   :  { %1318 = vadd.xlane.f32.xlu2 %v1317_v13  ;;  %1500 = vmatpush.msrb.mxu0 %v1370_v26 }
0x1149   :  { %1501 = vmatpush.msrb.mxu0 %v1369_v27 }
0x114b   :  { %1502 = vmatpush.msrb.mxu0 %v1368_v30 }
0x11a6   :  { %v1316_v2 = vpop.xlane.xlu1 %1315 }
0x11a7   :  { %v1320_v14 = vmul.f32 %v1316_v2, %v1878_v32 }
0x11a9   :  { %v1322_v15 = vsub.f32 %v1312_v10, %v1320_v14 }
0x11ab   :  { %v1324_v16 = vmul.f32 %v1322_v15, %v1322_v15 }
0x11ad   :  { %v1326_v17 = vsel %vm93_vm3, %v1324_v16, 0.0 }
0x11ae   :  { %1327 = vadd.xlane.f32.xlu0 %v1326_v17 }
0x11ba   :  { %v1319_v19 = vpop.xlane.xlu2 %1318 }
0x11bb   :  { %v1321_v39 = vmul.f32 %v1319_v19, %v1878_v32 }
0x11bd   :  { %v1323_v21 = vsub.f32 %v1313_v25, %v1321_v39 }
0x11bf   :  { %v1325_v22 = vmul.f32 %v1323_v21, %v1323_v21 }
0x11c1   :  { %v1329_v23 = vsel %vm93_vm3, %v1325_v22, 0.0 }
0x11c2   :  { %1330 = vadd.xlane.f32.xlu1 %v1329_v23 }
0x1221   :  { %v1328_v31 = vpop.xlane.xlu0 %1327 }
0x1222   :  { %v1332_v33 = vmul.f32 %v1328_v31, %v1878_v32 }
0x1224   :  { %v1334_v34 = vadd.f32 1e-12, %v1332_v33 }
0x1226   :  { %1748 = vrsqrt.f32 %v1334_v34  ;;  %vm1342_vm14 = vweird.f32 %v1334_v34 }
0x122c   :  { %v1749_v36 = vpop.eup %1748 }
0x122d   :  { %v1337_v40 = vmul.f32 %v1749_v36, %v1334_v34  ;;  %vm1343_vm13 = vweird.f32 %v1749_v36 }
0x122e   :  { %vm1344_vm15 = vmor %vm1342_vm14, %vm1343_vm13 }
0x122f   :  { %v1338_v41 = vmul.f32 %v1749_v36, %v1337_v40 }
0x1231   :  { %v1339_v43 = vmul.f32 0.5, %v1338_v41 }
0x1233   :  { %v1340_v44 = vsub.f32 1.5, %v1339_v43 }
0x1235   :  { %v1341_v45 = vmul.f32 %v1749_v36, %v1340_v44  ;;  %v1331_v47 = vpop.xlane.xlu1 %1330 }
0x1236   :  { %v1333_v29 = vmul.f32 %v1331_v47, %v1878_v32  ;;  %v1367_v32 = vld [vmem:[%s2335_s9 + $0x18] sm:$0xff] }
0x1237   :  { %v1345_v49 = vsel %vm1344_vm15, %v1749_v36, %v1341_v45  ;;  %1469 = vmatpush.msrb.mxu3 %v1367_v32 }
0x1238   :  { %v1356_v50 = vmul.f32 %v1345_v49, %v1322_v15  ;;  %v1335_v6 = vadd.f32 1e-12, %v1333_v29 }
0x1239   :  { %1470 = vmatpush.msrb.mxu3 %v1366_v12 }
0x123a   :  { %v1359_v28 = vmul.f32 %v1358_v48, %v1356_v50  ;;  %1750 = vrsqrt.f32 %v1335_v6  ;;  %vm1352_vm2 = vweird.f32 %v1335_v6 }
0x123b   :  { %1471 = vmatpush.msrb.mxu3 %v1365_v59 }
0x123c   :  { %v2266_v53 = vadd.f32 %v1361_v51, %v1359_v28 }
0x123d   :  { %1472 = vmatpush.msrb.mxu3 %v1364_v61 }
0x123e   :  { %v2269_v37 = vmul.f32 0.70710677, %v2266_v53  ;;  %1651 = vmatmul.msk.f32.vlgmr.msrb.gmra.mxu0 %vm93_vm3, %v2266_v53 }
0x1240   :  { %v1751_v55 = vpop.eup %1750  ;;  %v1380_v56 = vand.u32 2147483647, %v2269_v37  ;;  %vm1376_vm13 = vcmp.ge.f32.partialorder %v2269_v37, 0.0 }
0x1241   :  { %v1347_v57 = vmul.f32 %v1751_v55, %v1335_v6  ;;  %vm1353_vm1 = vweird.f32 %v1751_v55  ;;  %v1378_v6 = vsel %vm1376_vm13, 1.0, %v1776_v38 }
0x1242   :  { %v1382_v58 = vmul.f32 0.3275911, %v1380_v56  ;;  %vm1354_vm4 = vmor %vm1352_vm2, %vm1353_vm1  ;;  %v1432_v25 = vsub.f32 0.0, %v1380_v56 }
0x1243   :  { %v1348_v35 = vmul.f32 %v1751_v55, %v1347_v57 }
0x1244   :  { %v1384_v54 = vadd.f32 1.0, %v1382_v58  ;;  %v1434_v17 = vmul.f32 %v1432_v25, %v1380_v56  ;;  %v1372_v56 = vmul.f32 0.5, %v2266_v53 }
0x1245   :  { %v1349_v60 = vmul.f32 0.5, %v1348_v35 }
0x1246   :  { %1752 = vrcp.f32 %v1384_v54  ;;  %v1397_v5 = vand.u32 2147483648, %v1384_v54  ;;  %v1395_v42 = vand.u32 2147483647, %v1384_v54  ;;  %vm1391_vm6 = vweird.f32 %v1384_v54 }
0x1247   :  { %v1350_v62 = vsub.f32 1.5, %v1349_v60 }
0x1248   :  { %v1398_v7 = vor.u32 1.1754944e-38, %v1397_v5  ;;  %vm1396_vm8 = vcmp.eq.f32.partialorder %v1395_v42, 8.507059e+37 }
0x1249   :  { %v1351_v63 = vmul.f32 %v1751_v55, %v1350_v62 }
0x124b   :  { %v1355_v18 = vsel %vm1354_vm4, %v1751_v55, %v1351_v63 }
0x124c   :  { %v1753_v0 = vpop.eup %1752  ;;  %v1357_v1 = vmul.f32 %v1355_v18, %v1323_v21  ;;  %v1436_v21 = vmul.f32 1.442695, %v1434_v17 }
0x124d   :  { %v1387_v11 = vmul.f32 %v1753_v0, %v1384_v54  ;;  %vm1392_vm5 = vweird.f32 %v1753_v0 }
0x124e   :  { %v1360_v24 = vmul.f32 %v1358_v48, %v1357_v1  ;;  %vm1393_vm7 = vmor %vm1391_vm6, %vm1392_vm5 }
0x124f   :  { %v1388_v3 = vsub.f32 1.0, %v1387_v11 }
0x1250   :  { %v2286_v4 = vadd.f32 %v1361_v51, %v1360_v24 }
0x1251   :  { %v1389_v8 = vmul.f32 %v1753_v0, %v1388_v3  ;;  %v2305_v3 = vld [vmem:[%s2329_s10] sm:$0xff] }
0x1252   :  { %v2289_v9 = vmul.f32 0.70710677, %v2286_v4  ;;  %1652 = vmatmul.msk.f32.gmra.mxu0 %vm93_vm3, %v2286_v4  ;;  %v1373_v1 = vmul.f32 0.5, %v2286_v4  ;;  %v1480_v5 = vperm.slane %v2305_v3, 3 }
0x1253   :  { %v1390_v10 = vadd.f32 %v1753_v0, %v1389_v8 }
0x1254   :  { %v1381_v20 = vand.u32 2147483647, %v2289_v9  ;;  %vm1377_vm15 = vcmp.ge.f32.partialorder %v2289_v9, 0.0 }
0x1255   :  { %v1394_v46 = vsel %vm1393_vm7, %v1753_v0, %v1390_v10  ;;  %v1379_v53 = vsel %vm1377_vm15, 1.0, %v1776_v38  ;;  %vm1577_vm7 = vcmask 654336  }
0x1256   :  { %v1383_v13 = vmul.f32 0.3275911, %v1381_v20  ;;  %v1399_v2 = vsel %vm1396_vm8, %v1398_v7, %v1394_v46  ;;  %v1433_v48 = vsub.f32 0.0, %v1381_v20 }
0x1257   :  { %v1414_v14 = vmul.f32 1.0614054, %v1399_v2 }
0x1258   :  { %v1385_v15 = vadd.f32 1.0, %v1383_v13  ;;  %v1435_v55 = vmul.f32 %v1433_v48, %v1381_v20  ;;  %v1777_v20 = vmov 16.0  }
0x1259   :  { %v1416_v16 = vadd.f32 -1.4531521, %v1414_v14 }
0x125a   :  { %1754 = vrcp.f32 %v1385_v15  ;;  %v1411_v31 = vand.u32 2147483648, %v1385_v15  ;;  %v1409_v36 = vand.u32 2147483647, %v1385_v15  ;;  %vm1405_vm9 = vweird.f32 %v1385_v15 }
0x125b   :  { %v1418_v19 = vmul.f32 %v1416_v16, %v1399_v2  ;;  %1756 = vpow2.f32 %v1436_v21  ;;  %v1438_v35 = vmul.f32 1.442695, %v1435_v55 }
0x125c   :  { %v1412_v44 = vor.u32 1.1754944e-38, %v1411_v31  ;;  %vm1410_vm14 = vcmp.eq.f32.partialorder %v1409_v36, 8.507059e+37 }
0x125d   :  { %v1420_v39 = vadd.f32 1.4214138, %v1418_v19  ;;  %1758 = vpow2.f32 %v1438_v35 }
0x125e   :  { %1760 = vrcp.f32 %v1777_v20 }
0x125f   :  { %v1422_v22 = vmul.f32 %v1420_v39, %v1399_v2 }
0x1260   :  { %v1755_v23 = vpop.eup %1754 }
0x1261   :  { %v1401_v52 = vmul.f32 %v1755_v23, %v1385_v15  ;;  %v1424_v26 = vadd.f32 -0.28449672, %v1422_v22  ;;  %vm1406_vm12 = vweird.f32 %v1755_v23  ;;  %v1757_v43 = vpop.eup %1756 }
0x1262   :  { %vm1407_vm10 = vmor %vm1405_vm9, %vm1406_vm12 }
0x1263   :  { %v1426_v27 = vmul.f32 %v1424_v26, %v1399_v2  ;;  %v1402_v30 = vsub.f32 1.0, %v1401_v52  ;;  %v1759_v62 = vpop.eup %1758 }
0x1264   :  { %v1761_v7 = vpop.eup %1760 }
0x1265   :  { %v1428_v33 = vadd.f32 0.2548296, %v1426_v27  ;;  %v1403_v34 = vmul.f32 %v1755_v23, %v1402_v30  ;;  %v1517_v46 = vmul.f32 16.0, %v1761_v7 }
0x1267   :  { %v1430_v40 = vmul.f32 %v1428_v33, %v1399_v2  ;;  %v1404_v41 = vadd.f32 %v1755_v23, %v1403_v34  ;;  %v1518_v25 = vsub.f32 1.0, %v1517_v46 }
0x1269   :  { %v1440_v45 = vmul.f32 %v1757_v43, %v1430_v40  ;;  %v1408_v47 = vsel %vm1407_vm10, %v1755_v23, %v1404_v41  ;;  %v1519_v13 = vmul.f32 %v1761_v7, %v1518_v25 }
0x126a   :  { %v1413_v29 = vsel %vm1410_vm14, %v1412_v44, %v1408_v47  ;;  %v1561_v47 = vperm.slane %v2305_v3, 4 }
0x126b   :  { %v1442_v49 = vsub.f32 1.0, %v1440_v45  ;;  %v1415_v50 = vmul.f32 1.0614054, %v1413_v29  ;;  %v1520_v2 = vadd.f32 %v1761_v7, %v1519_v13 }
0x126d   :  { %v1444_v51 = vmul.f32 %v1442_v49, %v1378_v6  ;;  %v1417_v28 = vadd.f32 -1.4531521, %v1415_v50  ;;  %v1564_v50 = vperm.slane %v2305_v3, 5 }
0x126f   :  { %v1446_v57 = vadd.f32 1.0, %v1444_v51  ;;  %v1419_v32 = vmul.f32 %v1417_v28, %v1413_v29 }
0x1271   :  { %v1448_v12 = vmul.f32 %v1446_v57, %v1372_v56  ;;  %v1421_v58 = vadd.f32 1.4214138, %v1419_v32 }
0x1273   :  { %1649 = vmatmul.msk.f32.vlgmr.msrb.gmra.mxu3 %vm93_vm3, %v1448_v12  ;;  %v1423_v37 = vmul.f32 %v1421_v58, %v1413_v29 }
0x1275   :  { %v1425_v59 = vadd.f32 -0.28449672, %v1423_v37 }
0x1277   :  { %v1427_v54 = vmul.f32 %v1425_v59, %v1413_v29 }
0x1279   :  { %v1429_v60 = vadd.f32 0.2548296, %v1427_v54  ;;  %v1450_v54 = vperm.slane %v2305_v3, 2 }
0x127b   :  { %v1431_v61 = vmul.f32 %v1429_v60, %v1413_v29 }
0x127d   :  { %v1441_v63 = vmul.f32 %v1759_v62, %v1431_v61 }
0x127f   :  { %v1443_v18 = vsub.f32 1.0, %v1441_v63 }
0x1281   :  { %v1445_v0 = vmul.f32 %v1443_v18, %v1379_v53 }
0x1283   :  { %v1447_v11 = vadd.f32 1.0, %v1445_v0 }
0x1285   :  { %v1449_v24 = vmul.f32 %v1447_v11, %v1373_v1 }
0x1287   :  { %1650 = vmatmul.msk.f32.gmra.mxu3 %vm93_vm3, %v1449_v24  ;;  %vm1521_vm3 = vweird.f32 %v1761_v7 }
0x1288   :  { %v1522_v14 = vsel %vm1521_vm3, %v1761_v7, %v1520_v2 }
0x12bb   :  { %v1504_v8 = vpop.f32.mrf.mxu0 }
0x12bc   :  { %v1505_v42 = vadd.f32 %v1504_v8, %v1480_v5 }
0x12be   :  { %v1510_v9 = vsel %vm191_vm11, %v1505_v42, 0.0 }
0x12bf   :  { %1511 = vadd.xlane.f32.xlu2 %v1510_v9 }
0x12cf   :  { %v1507_v38 = vpop.f32.mrf.mxu0 }
0x12d0   :  { %v1508_v10 = vadd.f32 %v1507_v38, %v1480_v5 }
0x12d2   :  { %v1513_v4 = vsel %vm191_vm11, %v1508_v10, 0.0 }
0x12d3   :  { %1514 = vadd.xlane.f32.xlu0 %v1513_v4 }
0x12f6   :  { %v1474_v60 = vpop.f32.mrf.mxu3 }
0x12f7   :  { %v1475_v61 = vadd.f32 %v1474_v60, %v1450_v54 }
0x130a   :  { %v1477_v53 = vpop.f32.mrf.mxu3 }
0x130b   :  { %v1478_v0 = vadd.f32 %v1477_v53, %v1450_v54 }
0x1332   :  { %v1512_v15 = vpop.xlane.xlu2 %1511 }
0x1333   :  { %v1523_v16 = vmul.f32 %v1522_v14, %v1512_v15 }
0x1335   :  { %v1525_v17 = vsub.f32 %v1505_v42, %v1523_v16 }
0x1337   :  { %v1527_v19 = vmul.f32 %v1525_v17, %v1525_v17 }
0x1339   :  { %v1529_v39 = vsel %vm191_vm11, %v1527_v19, 0.0 }
0x133a   :  { %1530 = vadd.xlane.f32.xlu1 %v1529_v39 }
0x1346   :  { %v1515_v21 = vpop.xlane.xlu0 %1514 }
0x1347   :  { %v1524_v22 = vmul.f32 %v1522_v14, %v1515_v21 }
0x1349   :  { %v1526_v23 = vsub.f32 %v1508_v10, %v1524_v22 }
0x134b   :  { %v1528_v52 = vmul.f32 %v1526_v23, %v1526_v23 }
0x134d   :  { %v1532_v26 = vsel %vm191_vm11, %v1528_v52, 0.0 }
0x134e   :  { %1533 = vadd.xlane.f32.xlu2 %v1532_v26 }
0x13ad   :  { %v1531_v27 = vpop.xlane.xlu1 %1530 }
0x13ae   :  { %v1535_v30 = vmul.f32 %v1531_v27, %v1522_v14 }
0x13b0   :  { %v1537_v31 = vadd.f32 1e-05, %v1535_v30 }
0x13b2   :  { %1762 = vrsqrt.f32 %v1537_v31  ;;  %vm1545_vm2 = vweird.f32 %v1537_v31 }
0x13b8   :  { %v1763_v33 = vpop.eup %1762 }
0x13b9   :  { %v1540_v34 = vmul.f32 %v1763_v33, %v1537_v31  ;;  %vm1546_vm1 = vweird.f32 %v1763_v33 }
0x13ba   :  { %vm1547_vm4 = vmor %vm1545_vm2, %vm1546_vm1 }
0x13bb   :  { %v1541_v36 = vmul.f32 %v1763_v33, %v1540_v34 }
0x13bd   :  { %v1542_v40 = vmul.f32 0.5, %v1541_v36 }
0x13bf   :  { %v1543_v41 = vsub.f32 1.5, %v1542_v40 }
0x13c1   :  { %v1544_v43 = vmul.f32 %v1763_v33, %v1543_v41  ;;  %v1534_v44 = vpop.xlane.xlu2 %1533 }
0x13c2   :  { %v1536_v45 = vmul.f32 %v1534_v44, %v1522_v14 }
0x13c3   :  { %v1548_v48 = vsel %vm1547_vm4, %v1763_v33, %v1544_v43 }
0x13c4   :  { %v1538_v29 = vadd.f32 1e-05, %v1536_v45  ;;  %v1559_v49 = vmul.f32 %v1548_v48, %v1525_v17 }
0x13c6   :  { %1764 = vrsqrt.f32 %v1538_v29  ;;  %v1562_v6 = vmul.f32 %v1561_v47, %v1559_v49  ;;  %vm1555_vm5 = vweird.f32 %v1538_v29 }
0x13c8   :  { %v1565_v51 = vadd.f32 %v1564_v50, %v1562_v6 }
0x13ca   :  { %1569 = vrot.lane.b32.xlu0 %v1565_v51, %s1773_s18 }
0x13cc   :  { %v1765_v28 = vpop.eup %1764 }
0x13cd   :  { %v1550_v55 = vmul.f32 %v1765_v28, %v1538_v29  ;;  %vm1556_vm11 = vweird.f32 %v1765_v28 }
0x13ce   :  { %vm1557_vm6 = vmor %vm1555_vm5, %vm1556_vm11 }
0x13cf   :  { %v1551_v56 = vmul.f32 %v1765_v28, %v1550_v55 }
0x13d1   :  { %v1552_v57 = vmul.f32 0.5, %v1551_v56 }
0x13d3   :  { %v1553_v32 = vsub.f32 1.5, %v1552_v57 }
0x13d5   :  { %v1554_v12 = vmul.f32 %v1765_v28, %v1553_v32 }
0x13d7   :  { %v1558_v58 = vsel %vm1557_vm6, %v1765_v28, %v1554_v12 }
0x13d8   :  { %v1560_v35 = vmul.f32 %v1558_v58, %v1526_v23 }
0x13da   :  { %v1563_v37 = vmul.f32 %v1561_v47, %v1560_v35 }
0x13dc   :  { %v1566_v59 = vadd.f32 %v1564_v50, %v1563_v37 }
0x13de   :  { %1571 = vrot.lane.b32.xlu1 %v1566_v59, %s1773_s18 }
0x143c   :  { %v1570_v62 = vpop.permute.xlu0 %1569 }
0x143d   :  { %v1575_v63 = vsel %vm63_vm0, %v1475_v61, %v1570_v62 }
0x143e   :  { %v1578_v18 = vsel %vm1577_vm7, %v1575_v63, 0.0 }
0x143f   :  { %1580 = vst [vmem:[%s2336_s11] sm:$0xff] %v1578_v18 }
0x1450   :  { %v1572_v1 = vpop.permute.xlu1 %1571 }
0x1451   :  { %v1576_v11 = vsel %vm63_vm0, %v1478_v0, %v1572_v1 }
0x1452   :  { %v1579_v24 = vsel %vm1577_vm7, %v1576_v11, 0.0 }
0x1453   :  { %1581 = vst [vmem:[%s2336_s11 + $0x8] sm:$0xff] %v1579_v24 }

</bundles_post_ra>
